<compile_context>
chip_gen: v7x
topology: tpu7x:2x2x1
jax: 0.10.0
libtpu: 0.0.40
codegen_flags: <defaults>
</compile_context>

<pallas_src>
import functools
import math

import jax
import jax.numpy as jnp
from jax.experimental import pallas as pl
from jax.experimental.pallas import tpu as pltpu


def _mha_kernel(x_ref, wqkv_ref, bqkv_ref, wo_ref, bo_ref, o_ref, acc_ref, *,
                scale):
    h = pl.program_id(1)

    @pl.when(h == 0)
    def _init():
        acc_ref[...] = jnp.zeros_like(acc_ref)

    x = x_ref[0].astype(jnp.bfloat16)                         # (T, d_in)

    # Per-head fused-QKV projection (weights already bf16, head-leading layout).
    q = jnp.dot(x, wqkv_ref[0, 0], preferred_element_type=jnp.float32) + bqkv_ref[0, 0]
    k = jnp.dot(x, wqkv_ref[1, 0], preferred_element_type=jnp.float32) + bqkv_ref[1, 0]
    v = jnp.dot(x, wqkv_ref[2, 0], preferred_element_type=jnp.float32) + bqkv_ref[2, 0]

    q = (q * scale).astype(jnp.bfloat16)      # fold 1/sqrt(hd) into q
    k = k.astype(jnp.bfloat16)

    # scores = q @ k^T without an explicit transpose: contract last dims.
    s = jax.lax.dot_general(q, k, (((1,), (1,)), ((), ())),
                            preferred_element_type=jnp.float32)   # (T, T) f32

    # Numerically-stable softmax in f32; EUP reciprocal for the normalization.
    m = jnp.max(s, axis=-1, keepdims=True)
    p = jnp.exp(s - m)
    w = p * pl.reciprocal(jnp.sum(p, axis=-1, keepdims=True), approx=True)

    ctx = jnp.dot(w.astype(jnp.bfloat16), v.astype(jnp.bfloat16),
                  preferred_element_type=jnp.float32)             # (T, hd)

    # This head's slice of the output projection, accumulated in f32.
    acc_ref[...] += jnp.dot(ctx.astype(jnp.bfloat16), wo_ref[0],
                            preferred_element_type=jnp.float32)   # (T, d_out)

    @pl.when(h == pl.num_programs(1) - 1)
    def _finalize():
        o_ref[0] = (acc_ref[...] + bo_ref[...]).astype(o_ref.dtype)


def multi_head_attention(x, params, num_head):
    """x: (B, T, d_in) float32.  params: PyTorch-style (d_in,d_out)/(1,d_out)."""
    B, T, d_in = x.shape
    d_out = params["wq"].shape[1]
    assert d_out % num_head == 0, "d_out must be divisible by num_head"
    hd = d_out // num_head

    # --- host-side repack: head-leading, QKV fused into one tensor, bf16 ---
    def heads_w(w):                           # (d_in, d_out) -> (H, d_in, hd)
        return w.reshape(d_in, num_head, hd).transpose(1, 0, 2)

    w_qkv = jnp.stack([heads_w(params["wq"]), heads_w(params["wk"]),
                       heads_w(params["wv"])], axis=0).astype(jnp.bfloat16)  # (3,H,d_in,hd)
    b_qkv = jnp.stack([params["bq"].reshape(num_head, 1, hd),
                       params["bk"].reshape(num_head, 1, hd),
                       params["bv"].reshape(num_head, 1, hd)],
                      axis=0).astype(jnp.float32)                             # (3,H,1,hd)
    wo_h = params["wo"].reshape(num_head, hd, d_out).astype(jnp.bfloat16)     # (H,hd,d_out)
    bo = params["bo"].astype(jnp.float32)                                     # (1,d_out)

    kernel = functools.partial(_mha_kernel, scale=1.0 / math.sqrt(hd))

    flops = (B * 6 * T * d_in * d_out          # QKV projections
             + B * 4 * T * T * d_out           # Q.K^T and P.V
             + B * 2 * T * d_out * d_out)      # output projection
    bytes_accessed = (x.size * 4 + B * T * d_out * 4
                      + w_qkv.size * 2 + wo_h.size * 2
                      + b_qkv.size * 4 + bo.size * 4)
    cost = pl.CostEstimate(flops=flops,
                           transcendentals=B * num_head * T * T,
                           bytes_accessed=bytes_accessed)

    return pl.pallas_call(
        kernel,
        out_shape=jax.ShapeDtypeStruct((B, T, d_out), x.dtype),
        grid_spec=pltpu.PrefetchScalarGridSpec(
            num_scalar_prefetch=0,
            grid=(B, num_head),                                   # head = reduction axis (last)
            in_specs=[
                pl.BlockSpec((1, T, d_in), lambda b, h: (b, 0, 0)),          # x
                pl.BlockSpec((3, 1, d_in, hd), lambda b, h: (0, h, 0, 0)),   # W_qkv, this head
                pl.BlockSpec((3, 1, 1, hd), lambda b, h: (0, h, 0, 0)),      # b_qkv, this head
                pl.BlockSpec((1, hd, d_out), lambda b, h: (h, 0, 0)),        # W_out rows, this head
                pl.BlockSpec((1, d_out), lambda b, h: (0, 0)),               # b_out
            ],
            out_specs=pl.BlockSpec((1, T, d_out), lambda b, h: (b, 0, 0)),
            scratch_shapes=[pltpu.VMEM((T, d_out), jnp.float32)],
        ),
        compiler_params=pltpu.CompilerParams(
            dimension_semantics=("parallel", "arbitrary"),
            vmem_limit_bytes=64 * 1024 * 1024),
        cost_estimate=cost,
    )(x, w_qkv, b_qkv, wo_h, bo)


def _reference(x, params, num_head):
    """Pure-JAX f32 reference mirroring the PyTorch forward (eval mode)."""
    B, T, d_in = x.shape
    d_out = params["wq"].shape[1]
    hd = d_out // num_head

    def lin(w, b):
        return x @ w + b                                      # (B, T, d_out)

    def split(z):
        return z.reshape(B, T, num_head, hd).transpose(0, 2, 1, 3)  # (B,H,T,hd)

    q = split(lin(params["wq"], params["bq"]))
    k = split(lin(params["wk"], params["bk"]))
    v = split(lin(params["wv"], params["bv"]))
    s = jnp.einsum("bhqd,bhkd->bhqk", q, k) / math.sqrt(hd)
    w = jax.nn.softmax(s, axis=-1)
    ctx = jnp.einsum("bhqk,bhkd->bhqd", w, v)
    ctx = ctx.transpose(0, 2, 1, 3).reshape(B, T, d_out)
    return ctx @ params["wo"] + params["bo"]


def init_params(key, d_in, d_out):
    ks = jax.random.split(key, 8)

    def linear(kw, kb, fan_in, fan_out):
        bound = 1.0 / math.sqrt(fan_in)
        w = jax.random.uniform(kw, (fan_in, fan_out), jnp.float32, -bound, bound)
        b = jax.random.uniform(kb, (1, fan_out), jnp.float32, -bound, bound)
        return w, b

    wq, bq = linear(ks[0], ks[1], d_in, d_out)
    wk, bk = linear(ks[2], ks[3], d_in, d_out)
    wv, bv = linear(ks[4], ks[5], d_in, d_out)
    wo, bo = linear(ks[6], ks[7], d_out, d_out)
    return dict(wq=wq, bq=bq, wk=wk, bk=bk, wv=wv, bv=bv, wo=wo, bo=bo)


if __name__ == "__main__":
    # Small but lane-friendly demo shapes: T multiple of 8, features multiples of 128.
    B, T, d_in, d_out, num_head = 2, 64, 128, 256, 4

    key = jax.random.PRNGKey(0)
    kx, kp = jax.random.split(key)
    x = jax.random.normal(kx, (B, T, d_in), dtype=jnp.float32)
    params = init_params(kp, d_in, d_out)

    out = jax.block_until_ready(multi_head_attention(x, params, num_head))

    ref = _reference(x, params, num_head)
    assert out.shape == (B, T, d_out)
    # bf16 MXU operands (f32 accumulation) -> compare to the f32 reference loosely.
    assert jnp.allclose(out, ref, atol=3e-2, rtol=3e-2), "mismatch vs reference"

    print("KERNEL_OK")
</pallas_src>

<mosaic_0001>
module attributes {stable_mosaic.version = 11 : i64} {
  func.func @_mha_kernel(%arg0: i32, %arg1: i32, %arg2: memref<1x64x128xf32, #tpu.memory_space<vmem>>, %arg3: memref<3x1x128x64xbf16, #tpu.memory_space<vmem>>, %arg4: memref<3x1x1x64xf32, #tpu.memory_space<vmem>>, %arg5: memref<1x64x256xbf16, #tpu.memory_space<vmem>>, %arg6: memref<1x256xf32, #tpu.memory_space<vmem>>, %arg7: memref<1x64x256xf32, #tpu.memory_space<vmem>>, %arg8: memref<64x256xf32, #tpu.memory_space<vmem>>) attributes {dimension_semantics = [#tpu.dimension_semantics<parallel>, #tpu.dimension_semantics<arbitrary>], iteration_bounds = array<i64: 2, 4>, scalar_prefetch = 0 : i64, scratch_operands = 1 : i64, tpu.core_type = #tpu.core_type<tc>, window_params = [{transform_indices = @transform_0, window_bounds = array<i64: 1, 64, 128>}, {transform_indices = @transform_1, window_bounds = array<i64: 3, 1, 128, 64>}, {transform_indices = @transform_2, window_bounds = array<i64: 3, 1, 1, 64>}, {transform_indices = @transform_3, window_bounds = array<i64: 1, 64, 256>}, {pipeline_mode = #tpu.pipeline_mode<synchronous>, transform_indices = @transform_4, window_bounds = array<i64: 1, 256>}, {transform_indices = @transform_5, window_bounds = array<i64: 1, 64, 256>}]} {
    %c0_i32 = arith.constant 0 : i32
    %0 = arith.cmpi eq, %arg1, %c0_i32 : i32
    %1 = arith.extui %0 : i1 to i32
    %c0_i32_0 = arith.constant 0 : i32
    %2 = arith.cmpi ne, %1, %c0_i32_0 : i32
    scf.if %2 {
      %cst_41 = arith.constant 0.000000e+00 : f32
      %55 = vector.broadcast %cst_41 : f32 to vector<64x256xf32>
      %c0_42 = arith.constant 0 : index
      %c0_43 = arith.constant 0 : index
      %56 = vector.load %arg8[%c0_42, %c0_43] : memref<64x256xf32, #tpu.memory_space<vmem>>, vector<64x256xf32>
      tpu.vector_store %arg8[%c0_42, %c0_43], %55 {strides = array<i32>} : memref<64x256xf32, #tpu.memory_space<vmem>>, vector<64x256xf32>,
    } else {
    }
    %c0 = arith.constant 0 : index
    %c0_1 = arith.constant 0 : index
    %c0_2 = arith.constant 0 : index
    %3 = vector.load %arg2[%c0, %c0_1, %c0_2] : memref<1x64x128xf32, #tpu.memory_space<vmem>>, vector<1x64x128xf32>
    %4 = vector.shape_cast %3 : vector<1x64x128xf32> to vector<64x128xf32>
    %5 = arith.truncf %4 : vector<64x128xf32> to vector<64x128xbf16>
    %c0_3 = arith.constant 0 : index
    %c0_4 = arith.constant 0 : index
    %c0_5 = arith.constant 0 : index
    %c0_6 = arith.constant 0 : index
    %6 = vector.load %arg3[%c0_3, %c0_4, %c0_5, %c0_6] : memref<3x1x128x64xbf16, #tpu.memory_space<vmem>>, vector<1x1x128x64xbf16>
    %7 = vector.shape_cast %6 : vector<1x1x128x64xbf16> to vector<128x64xbf16>
    %cst = arith.constant dense<0.000000e+00> : vector<64x64xf32>
    %8 = tpu.matmul %5, %7, %cst {dimension_numbers = #tpu.dot_dimension_numbers<[1], [0], [0], [1], [0, 0, 1, 1], [], []>} : vector<64x128xbf16>, vector<128x64xbf16>, vector<64x64xf32> -> vector<64x64xf32>
    %c0_7 = arith.constant 0 : index
    %c0_8 = arith.constant 0 : index
    %c0_9 = arith.constant 0 : index
    %c0_10 = arith.constant 0 : index
    %9 = vector.load %arg4[%c0_7, %c0_8, %c0_9, %c0_10] : memref<3x1x1x64xf32, #tpu.memory_space<vmem>>, vector<1x1x1x64xf32>
    %10 = vector.shape_cast %9 : vector<1x1x1x64xf32> to vector<1x64xf32>
    %11 = vector.broadcast %10 : vector<1x64xf32> to vector<64x64xf32>
    %12 = arith.addf %8, %11 : vector<64x64xf32>
    %c1 = arith.constant 1 : index
    %c0_11 = arith.constant 0 : index
    %c0_12 = arith.constant 0 : index
    %c0_13 = arith.constant 0 : index
    %13 = vector.load %arg3[%c1, %c0_11, %c0_12, %c0_13] : memref<3x1x128x64xbf16, #tpu.memory_space<vmem>>, vector<1x1x128x64xbf16>
    %14 = vector.shape_cast %13 : vector<1x1x128x64xbf16> to vector<128x64xbf16>
    %cst_14 = arith.constant dense<0.000000e+00> : vector<64x64xf32>
    %15 = tpu.matmul %5, %14, %cst_14 {dimension_numbers = #tpu.dot_dimension_numbers<[1], [0], [0], [1], [0, 0, 1, 1], [], []>} : vector<64x128xbf16>, vector<128x64xbf16>, vector<64x64xf32> -> vector<64x64xf32>
    %c1_15 = arith.constant 1 : index
    %c0_16 = arith.constant 0 : index
    %c0_17 = arith.constant 0 : index
    %c0_18 = arith.constant 0 : index
    %16 = vector.load %arg4[%c1_15, %c0_16, %c0_17, %c0_18] : memref<3x1x1x64xf32, #tpu.memory_space<vmem>>, vector<1x1x1x64xf32>
    %17 = vector.shape_cast %16 : vector<1x1x1x64xf32> to vector<1x64xf32>
    %18 = vector.broadcast %17 : vector<1x64xf32> to vector<64x64xf32>
    %19 = arith.addf %15, %18 : vector<64x64xf32>
    %c2 = arith.constant 2 : index
    %c0_19 = arith.constant 0 : index
    %c0_20 = arith.constant 0 : index
    %c0_21 = arith.constant 0 : index
    %20 = vector.load %arg3[%c2, %c0_19, %c0_20, %c0_21] : memref<3x1x128x64xbf16, #tpu.memory_space<vmem>>, vector<1x1x128x64xbf16>
    %21 = vector.shape_cast %20 : vector<1x1x128x64xbf16> to vector<128x64xbf16>
    %cst_22 = arith.constant dense<0.000000e+00> : vector<64x64xf32>
    %22 = tpu.matmul %5, %21, %cst_22 {dimension_numbers = #tpu.dot_dimension_numbers<[1], [0], [0], [1], [0, 0, 1, 1], [], []>} : vector<64x128xbf16>, vector<128x64xbf16>, vector<64x64xf32> -> vector<64x64xf32>
    %c2_23 = arith.constant 2 : index
    %c0_24 = arith.constant 0 : index
    %c0_25 = arith.constant 0 : index
    %c0_26 = arith.constant 0 : index
    %23 = vector.load %arg4[%c2_23, %c0_24, %c0_25, %c0_26] : memref<3x1x1x64xf32, #tpu.memory_space<vmem>>, vector<1x1x1x64xf32>
    %24 = vector.shape_cast %23 : vector<1x1x1x64xf32> to vector<1x64xf32>
    %25 = vector.broadcast %24 : vector<1x64xf32> to vector<64x64xf32>
    %26 = arith.addf %22, %25 : vector<64x64xf32>
    %cst_27 = arith.constant 1.250000e-01 : f32
    %27 = vector.broadcast %cst_27 : f32 to vector<64x64xf32>
    %28 = arith.mulf %12, %27 : vector<64x64xf32>
    %29 = arith.truncf %28 : vector<64x64xf32> to vector<64x64xbf16>
    %30 = arith.truncf %19 : vector<64x64xf32> to vector<64x64xbf16>
    %cst_28 = arith.constant dense<0.000000e+00> : vector<64x64xf32>
    %31 = tpu.matmul %29, %30, %cst_28 {dimension_numbers = #tpu.dot_dimension_numbers<[1], [1], [0], [0], [0, 0, 1, 0], [], []>} : vector<64x64xbf16>, vector<64x64xbf16>, vector<64x64xf32> -> vector<64x64xf32>
    %cst_29 = arith.constant dense<0xFF800000> : vector<64xf32>
    %32 = vector.multi_reduction <maximumf>, %31, %cst_29 [1] : vector<64x64xf32> to vector<64xf32>
    %33 = vector.shape_cast %32 : vector<64xf32> to vector<64x1xf32>
    %34 = vector.broadcast %33 : vector<64x1xf32> to vector<64x64xf32>
    %35 = arith.subf %31, %34 : vector<64x64xf32>
    %36 = math.exp %35 : vector<64x64xf32>
    %cst_30 = arith.constant dense<0.000000e+00> : vector<64xf32>
    %37 = vector.multi_reduction <add>, %36, %cst_30 [1] : vector<64x64xf32> to vector<64xf32>
    %38 = vector.shape_cast %37 : vector<64xf32> to vector<64x1xf32>
    %39 = tpu.reciprocal %38 {approx = true} : vector<64x1xf32> -> vector<64x1xf32>
    %40 = vector.broadcast %39 : vector<64x1xf32> to vector<64x64xf32>
    %41 = arith.mulf %36, %40 : vector<64x64xf32>
    %42 = arith.truncf %41 : vector<64x64xf32> to vector<64x64xbf16>
    %43 = arith.truncf %26 : vector<64x64xf32> to vector<64x64xbf16>
    %cst_31 = arith.constant dense<0.000000e+00> : vector<64x64xf32>
    %44 = tpu.matmul %42, %43, %cst_31 {dimension_numbers = #tpu.dot_dimension_numbers<[1], [0], [0], [1], [0, 0, 1, 1], [], []>} : vector<64x64xbf16>, vector<64x64xbf16>, vector<64x64xf32> -> vector<64x64xf32>
    %c0_32 = arith.constant 0 : index
    %c0_33 = arith.constant 0 : index
    %45 = vector.load %arg8[%c0_32, %c0_33] : memref<64x256xf32, #tpu.memory_space<vmem>>, vector<64x256xf32>
    %46 = arith.truncf %44 : vector<64x64xf32> to vector<64x64xbf16>
    %c0_34 = arith.constant 0 : index
    %c0_35 = arith.constant 0 : index
    %c0_36 = arith.constant 0 : index
    %47 = vector.load %arg5[%c0_34, %c0_35, %c0_36] : memref<1x64x256xbf16, #tpu.memory_space<vmem>>, vector<1x64x256xbf16>
    %48 = vector.shape_cast %47 : vector<1x64x256xbf16> to vector<64x256xbf16>
    %cst_37 = arith.constant dense<0.000000e+00> : vector<64x256xf32>
    %49 = tpu.matmul %46, %48, %cst_37 {dimension_numbers = #tpu.dot_dimension_numbers<[1], [0], [0], [1], [0, 0, 1, 1], [], []>} : vector<64x64xbf16>, vector<64x256xbf16>, vector<64x256xf32> -> vector<64x256xf32>
    %50 = arith.addf %45, %49 : vector<64x256xf32>
    %c0_38 = arith.constant 0 : index
    %c0_39 = arith.constant 0 : index
    %51 = vector.load %arg8[%c0_38, %c0_39] : memref<64x256xf32, #tpu.memory_space<vmem>>, vector<64x256xf32>
    tpu.vector_store %arg8[%c0_38, %c0_39], %50 {strides = array<i32>} : memref<64x256xf32, #tpu.memory_space<vmem>>, vector<64x256xf32>,
    %c3_i32 = arith.constant 3 : i32
    %52 = arith.cmpi eq, %arg1, %c3_i32 : i32
    %53 = arith.extui %52 : i1 to i32
    %c0_i32_40 = arith.constant 0 : i32
    %54 = arith.cmpi ne, %53, %c0_i32_40 : i32
    scf.if %54 {
      %c0_41 = arith.constant 0 : index
      %c0_42 = arith.constant 0 : index
      %55 = vector.load %arg8[%c0_41, %c0_42] : memref<64x256xf32, #tpu.memory_space<vmem>>, vector<64x256xf32>
      %c0_43 = arith.constant 0 : index
      %c0_44 = arith.constant 0 : index
      %56 = vector.load %arg6[%c0_43, %c0_44] : memref<1x256xf32, #tpu.memory_space<vmem>>, vector<1x256xf32>
      %57 = vector.broadcast %56 : vector<1x256xf32> to vector<64x256xf32>
      %58 = arith.addf %55, %57 : vector<64x256xf32>
      %c0_45 = arith.constant 0 : index
      %c0_46 = arith.constant 0 : index
      %c0_47 = arith.constant 0 : index
      %59 = vector.load %arg7[%c0_45, %c0_46, %c0_47] : memref<1x64x256xf32, #tpu.memory_space<vmem>>, vector<1x64x256xf32>
      %60 = vector.shape_cast %59 : vector<1x64x256xf32> to vector<64x256xf32>
      %61 = vector.shape_cast %58 : vector<64x256xf32> to vector<1x64x256xf32>
      tpu.vector_store %arg7[%c0_45, %c0_46, %c0_47], %61 {strides = array<i32>} : memref<1x64x256xf32, #tpu.memory_space<vmem>>, vector<1x64x256xf32>,
    } else {
    }
    return
  }
  func.func @transform_0(%arg0: i32, %arg1: i32) -> (i32, i32, i32) {
    %c0_i32 = arith.constant 0 : i32
    %c0_i32_0 = arith.constant 0 : i32
    %c0_i32_1 = arith.constant 0 : i32
    return %arg0, %c0_i32, %c0_i32_0 : i32, i32, i32
  }
  func.func @transform_1(%arg0: i32, %arg1: i32) -> (i32, i32, i32, i32) {
    %c0_i32 = arith.constant 0 : i32
    %c0_i32_0 = arith.constant 0 : i32
    %c0_i32_1 = arith.constant 0 : i32
    %c0_i32_2 = arith.constant 0 : i32
    return %c0_i32, %arg1, %c0_i32_0, %c0_i32_1 : i32, i32, i32, i32
  }
  func.func @transform_2(%arg0: i32, %arg1: i32) -> (i32, i32, i32, i32) {
    %c0_i32 = arith.constant 0 : i32
    %c0_i32_0 = arith.constant 0 : i32
    %c0_i32_1 = arith.constant 0 : i32
    %c0_i32_2 = arith.constant 0 : i32
    return %c0_i32, %arg1, %c0_i32_0, %c0_i32_1 : i32, i32, i32, i32
  }
  func.func @transform_3(%arg0: i32, %arg1: i32) -> (i32, i32, i32) {
    %c0_i32 = arith.constant 0 : i32
    %c0_i32_0 = arith.constant 0 : i32
    %c0_i32_1 = arith.constant 0 : i32
    return %arg1, %c0_i32, %c0_i32_0 : i32, i32, i32
  }
  func.func @transform_4(%arg0: i32, %arg1: i32) -> (i32, i32) {
    %c0_i32 = arith.constant 0 : i32
    %c0_i32_0 = arith.constant 0 : i32
    %c0_i32_1 = arith.constant 0 : i32
    return %c0_i32, %c0_i32_0 : i32, i32
  }
  func.func @transform_5(%arg0: i32, %arg1: i32) -> (i32, i32, i32) {
    %c0_i32 = arith.constant 0 : i32
    %c0_i32_0 = arith.constant 0 : i32
    %c0_i32_1 = arith.constant 0 : i32
    return %arg0, %c0_i32, %c0_i32_0 : i32, i32, i32
  }
}

</mosaic_0001>

<bundles_post_ra>
// kernel: tpu_custom_call.1
= control target key start
LH: loop header
LB: loop body
LE: loop exit
PB: predicated region body
PF: predicated region fallthrough
CT: control target
= control target key end

     0   :  { %s2903_s0 = inlined_call_operand.hbm [shape: f32[2,64,128], index: 0, kind: input, shape index: {}]   ;;  %s2904_s1 = inlined_call_operand.hbm [shape: bf16[3,4,128,64], index: 1, kind: input, shape index: {}]   ;;  %s2905_s2 = inlined_call_operand.hbm [shape: f32[3,4,1,64], index: 2, kind: input, shape index: {}]   ;;  %s2906_s3 = inlined_call_operand.hbm [shape: bf16[4,64,256], index: 3, kind: input, shape index: {}]   ;;  %s2907_s4 = inlined_call_operand.hbm [shape: f32[1,256], index: 4, kind: input, shape index: {}]   ;;  %s2908_s5 = inlined_call_operand.hbm [shape: f32[2,64,256], index: 5, kind: output, shape index: {}]  }
   0x1   :  { %2928 = sst [smem:[#allocation29_spill]] %s2903_s0 }
   0x2   :  { %2929 = sst [smem:[#allocation30_spill]] %s2904_s1 }
   0x3   :  { %2930 = sst [smem:[#allocation31_spill]] %s2905_s2 }
   0x4   :  { %2931 = sst [smem:[#allocation32_spill]] %s2907_s4 }
   0x5   :  { %2932 = sst [smem:[#allocation33_spill]] %s2908_s5 }
   0x6   :  { %10 = vsyncpa [#allocation4], 0 }
   0x7   :  { %12 = vsyncpa [#allocation4 + $0x1], 0 }
   0x8   :  { %13 = vsyncpa [#allocation7], 0 }
   0x9   :  { %15 = vsyncpa [#allocation7 + $0x1], 0 }
   0xa   :  { %16 = vsyncpa [#allocation10], 0 }
   0xb   :  { %18 = vsyncpa [#allocation10 + $0x1], 0 }
   0xc   :  { %19 = vsyncpa [#allocation5], 0 }
   0xd   :  { %21 = vsyncpa [#allocation5 + $0x1], 0  ;;  %s2341_s18 = smov 0   ;;  %s2343_s19 = smov 0  }
   0xe   :  { %s2345_s20 = smov 0   ;;  %s2347_s21 = smov 0  }
   0xf   :  { %s2349_s22 = smov 0   ;;  %s2351_s23 = smov 0  }
  0x10   :  { %s2353_s24 = smov 0   ;;  %s2355_s25 = smov 0  }
  0x11   :  { %s2357_s26 = smov 0   ;;  %s2359_s27 = smov 0  }
  0x12   :  { %s2361_s28 = smov 0  }
  0x13 LB: > { %2933 = sst [smem:[#allocation21_spill]] %s2261_s21  ;;  %s2397_s29 = sadd.s32 4294967295, %s2289_s28   ;;  %s2289_s28 = sphi %s2361_s28, %s27_s28   ;;  %s2285_s27 = sphi %s2359_s27, %s2977_s27   ;;  %s2281_s26 = sphi %s2357_s26, %s2984_s26   ;;  %s2277_s25 = sphi %s2355_s25, %s2975_s25   ;;  %s2273_s24 = sphi %s2353_s24, %s2983_s24   ;;  %s2269_s23 = sphi %s2351_s23, %s2974_s23   ;;  %s2265_s22 = sphi %s2349_s22, %s2982_s22   ;;  %s2261_s21 = sphi %s2347_s21, %s2981_s21   ;;  %s2257_s20 = sphi %s2345_s20, %s2980_s20   ;;  %s2253_s19 = sphi %s2343_s19, %s2979_s19   ;;  %s2249_s18 = sphi %s2341_s18, %s2978_s18  }
  0x14   : > { %2934 = sst [smem:[#allocation22_spill]] %s2269_s23  ;;  %s1555_s30 = sadd.s32 4294967294, %s2289_s28  }
  0x15   : > { %2935 = sst [smem:[#allocation23_spill]] %s2285_s27  ;;  %s36_s6 = sadd.s32 1, %s2281_s26 }
  0x16   : > { %s39_s7 = sadd.s32 1, %s2285_s27  ;;  %p37_p0 = scmp.ge.s32.totalorder %s36_s6, 4 }
  0x17   : > { %s46_s8 = sadd.s32 1, %s2269_s23  ;;  %p2910_p1 = scmp.ne.s32.totalorder %s2269_s23, %s2265_s22 }
  0x18   : > { %p54_p2 = scmp.eq.s32.totalorder %s2289_s28, 0  ;;  %s2986_s6 = smov (%p37_p0, %s36_s6), 0 }
  0x19   : > { %2936 = sst [smem:[#allocation24_spill]] %s2986_s6  ;;  %s2988_s7 = smov (!%p37_p0, %s39_s7), %s2285_s27 }
  0x1a   : > { %p2414_p3 = por %p54_p2, %p2910_p1  ;;  %p2909_p4 = scmp.ne.s32.totalorder %s2265_s22, %s2261_s21 }
  0x1b   : > { %p41_p5 = scmp.ge.s32.totalorder %s2988_s7, 2  ;;  %p2918_p6 = scmp.eq.s32.totalorder %s2397_s29, 0 }
  0x1c   : > { %s2937_s9 = scalar_select %p2414_p3, 1, 0 }
  0x1d   : > { %s69_s10 = ssub.s32 %s2281_s26, %s2986_s6  ;;  %s72_s11 = sadd.s32 1, %s2257_s20 }
  0x1e   : > { %s2990_s7 = smov (%p41_p5, %s2988_s7), 0  ;;  %p2431_p7 = por %p2918_p6, %p2909_p4 }
  0x1f   : > { %2938 = sst [smem:[#allocation25_spill]] %s2990_s7  ;;  %p70_p8 = scmp.eq.s32.totalorder %s69_s10, 0 }
  0x20   : > { %s2939_s12 = scalar_select %p2431_p7, 1, 0 }
  0x21   : > { %s43_s13 = ssub.s32 %s2285_s27, %s2990_s7  ;;  %p79_p9 = scmp.ne.s32.totalorder %s2257_s20, %s2253_s19 }
  0x22   : > { %p44_p10 = scmp.eq.s32.totalorder %s43_s13, 0  ;;  %p85_p11 = scmp.ne.s32.totalorder %s2253_s19, %s2249_s18 }
  0x23   : > { %s2442_s14 = scalar_select %p70_p8, %s2257_s20, %s72_s11  }
  0x24   : > { %s2445_s15 = scalar_select %p44_p10, %s2269_s23, %s46_s8  }
  0x25   : > { %2940 = sst [smem:[#allocation26_spill]] %s2442_s14  ;;  %p2449_p12 = por %p79_p9, %p54_p2 }
  0x26   : > { %2941 = sst [smem:[#allocation27_spill]] %s2445_s15  ;;  %p2455_p13 = por %p85_p11, %p2918_p6 }
  0x27   : > { %s2942_s16 = scalar_select %p2449_p12, 1, 0 }
  0x28   : > { %s2943_s17 = scalar_select %p2455_p13, 1, 0 }
  0x29   : > { %p182_p0 = scmp.eq.s32.totalorder %s2397_s29, 7  ;;  %p188_p5 = scmp.eq.s32.totalorder %s1555_s30, 7 }
  0x2a   : > { %p1556_p4 = scmp.ge.s32.totalorder %s2289_s28, 1  ;;  %p195_p1 = scmp.lt.s32.totalorder %s2289_s28, 9 }
  0x2b   : > { %p2944_p7 = scmp.ne.s32.totalorder %s2269_s23, %s2265_s22  ;;  %p2946_p8 = scmp.ne.s32.totalorder %s2265_s22, %s2261_s21 }
  0x2c   : > { %p2476_p2 = pnand %p1556_p4, %p195_p1  ;;  %s2291_s30 = smov [#allocation11]  }
  0x2d   : > { %p2465_p3 = por %p182_p0, %p2944_p7  ;;  %p2472_p10 = por %p188_p5, %p2946_p8 }
  0x2e   : > { %s2949_s10 = scalar_select %p2476_p2, 1, 0 }
  0x2f   : > { %s2945_s18 = scalar_select %p2465_p3, 1, 0 }
  0x30   : > { %s2947_s8 = scalar_select %p2472_p10, 1, 0 }
  0x31   : > { %p1860_p9 = pneg %p2476_p2  ;;  %s208_s11 = sshll.u32 %s2291_s30, 4  ;;  %s209_s11 = int_to_ptr.vmem [resolvable:$true] %s208_s11 }
  0x32   : > { %2948 = sst [smem:[#allocation28_spill]] %s2947_s8  ;;  %s2951_s4 = sld [smem:[#allocation32_spill]] }
  0x33   : > { %p2484_p7 = pnand %p1860_p9, %p2918_p6 }
  0x35   : > { %p2045_p4 = pneg %p2484_p7 }
  0x38   : > { %s2043_s15 = scalar_lea.hbm %s2951_s4, 32 }
  0x39   : > { %p2044_p1 = scmp.ne.s32.totalorder %s2951_s4, %s2043_s15  ;;  %p2050_p5 = scmp.lt.u32.totalorder %s2043_s15, %s2951_s4 }
  0x3b   : > { %p2046_p11 = pnand %p2045_p4, %p2044_p1 }
  0x3d   : > { %p2047_p0 = pneg %p2046_p11 }
  0x3f   : > { %p2052_p8 = pnand %p2050_p5, %p2047_p0 }
  0x41   : > { %2055 = shalt.err (!%p2052_p8)
}
  0x42   : > { %s2056_s5 = scalar_lea.vmem %s209_s11, 32  ;;  %p2064_p3 = scmp.lt.s32.totalorder %s209_s11, %s209_s11 }
  0x43   : > { %p2057_p9 = scmp.ne.s32.totalorder %s209_s11, %s2056_s5  ;;  %p2065_p13 = scmp.lt.s32.totalorder %s2056_s5, %s2056_s5 }
  0x45   : > { %p2059_p6 = pnand %p2057_p9, %p2045_p4  ;;  %p2066_p2 = por %p2065_p13, %p2064_p3 }
  0x47   : > { %p2060_p10 = pneg %p2059_p6 }
  0x49   : > { %p2067_p12 = pnand %p2066_p2, %p2060_p10 }
  0x4b   : > { %2070 = shalt.err (!%p2067_p12)
}
  0x4c   : > { %1863 = dma.hbm_to_vmem [thread:$0]  (!%p2484_p7), %s2951_s4, 32, %s209_s11, [#allocation10]  }
  0x4d   : > { %p1558_p1 = scmp.ge.s32.totalorder %s2289_s28, 8 }
  0x4e   : > { %s219_s21 = sand.u32 (!%p1558_p1), 1, %s2269_s23   ;;  %s1663_s14 = sshll.u32 (!%p1558_p1), %s2285_s27, 10 }
  0x4f   : > { %215 = sbr.rel (%p1558_p1) target bundleno = 180 (0xb4), region = 20  ;;  %s1559_s15 = sshll.u32 (!%p1558_p1), %s219_s21, 6 }
  0x50   : > { %s2952_s0 = sld [smem:[#allocation29_spill]] (!%p1558_p1)  ;;  %s223_s13 = scalar_lea.vmem (!%p1558_p1), [#allocation3], %s1559_s15 }
  0x51   : > { %s230_s11 = sshll.u32 (!%p1558_p1), %s223_s13, 4  ;;  %s2514_s6 = scalar_lea.sflag (!%p1558_p1), [#allocation4], %s219_s21  ;;  %s2512_s11 = int_to_ptr.vmem [resolvable:$true] %s230_s11 }
  0x52   : > { %p2953_p6 = scmp.ne.s32.totalorder (!%p1558_p1), %s2937_s9, 0 }
  0x56   : > { %s2510_s30 = scalar_lea.hbm %s2952_s0, %s1663_s14  ;;  %s2075_s14 = scalar_lea.hbm %s2952_s0, 2048 }
  0x57   : > { %s2071_s7 = scalar_lea.hbm %s2510_s30, 1024  ;;  %p2076_p10 = scmp.lt.u32.totalorder %s2510_s30, %s2952_s0 }
  0x58   : > { %p2072_p3 = scmp.ne.s32.totalorder %s2510_s30, %s2071_s7  ;;  %p2077_p2 = scmp.lt.u32.totalorder %s2075_s14, %s2071_s7 }
  0x59   : > { %p2079_p4 = scmp.lt.u32.totalorder %s2071_s7, %s2510_s30 }
  0x5a   : > { %p2073_p12 = pnand %p2072_p3, %p2953_p6  ;;  %p2078_p7 = por %p2077_p2, %p2076_p10 }
  0x5c   : > { %p2074_p13 = pneg %p2073_p12  ;;  %p2080_p11 = por %p2079_p4, %p2078_p7 }
  0x5e   : > { %p2081_p0 = pnand %p2080_p11, %p2074_p13 }
  0x60   : > { %2084 = shalt.err (!%p2081_p0)
}
  0x61   : > { %s2085_s21 = scalar_lea.vmem %s2512_s11, 1024  ;;  %s2292_s4 = smov [#allocation3]  }
  0x62   : > { %p2086_p5 = scmp.ne.s32.totalorder %s2512_s11, %s2085_s21  ;;  %s2089_s27 = sshll.u32 %s2292_s4, 4  ;;  %s2090_s27 = int_to_ptr.vmem [resolvable:$false] %s2089_s27 }
  0x63   : > { %s2091_s15 = scalar_lea.vmem %s2090_s27, 2048  ;;  %p2092_p1 = scmp.lt.s32.totalorder %s2512_s11, %s2090_s27 }
  0x64   : > { %p2087_p8 = pnand %p2086_p5, %p2953_p6  ;;  %p2093_p3 = scmp.lt.s32.totalorder %s2091_s15, %s2085_s21 }
  0x66   : > { %p2088_p9 = pneg %p2087_p8  ;;  %p2094_p12 = por %p2093_p3, %p2092_p1 }
  0x68   : > { %p2095_p10 = pnand %p2094_p12, %p2088_p9 }
  0x6a   : > { %2098 = shalt.err (!%p2095_p10)
}
  0x6b   : > { %s2924_s13 = smov 128   ;;  %s2925_s7 = smov 8  }
  0x6c   : > { %1841 = dma.hbm_to_vmem [thread:$0]  (%p2953_p6), %s2510_s30, 1024, %s2512_s11, %s2514_s6, %s2924_s13, %s2924_s13, %s2925_s7  }
  0x6d   : > { %s2543_s8 = sand.u32 1, %s2257_s20   ;;  %s2926_s9 = sshll.u32 %s2281_s26, 10 }
  0x6e   : > { %s1835_s5 = smul.u32 192, %s2543_s8  ;;  %p2954_p13 = scmp.ne.s32.totalorder %s2942_s16, 0 }
  0x6f   : > { %s2955_s1 = sld [smem:[#allocation30_spill]]  ;;  %s2295_s4 = smov 4096  }
  0x70   : > { %s1842_s21 = scalar_select %p2954_p13, [#allocation0], [#allocation15] }
  0x71   : > { %1843 = sst [smem:[#allocation14]] (%p2954_p13), %s2295_s4  ;;  %s244_s15 = scalar_lea.vmem [#allocation6], %s1835_s5 }
  0x72   : > { %s255_s27 = sld [smem:[%s1842_s21]]   ;;  %s263_s13 = sshll.u32 %s244_s15, 4  ;;  %s264_s13 = int_to_ptr.vmem [resolvable:$true] %s263_s13 }
  0x73   : > { %s2296_s7 = smov 1024   ;;  %s2297_s14 = smov 16  }
  0x74   : > { %1844 = sst [smem:[#allocation14 + $0x1]] (%p2954_p13), %s2296_s7  ;;  %s2298_s0 = smov 64  }
  0x75   : > { %s250_s6 = scalar_lea.hbm %s2955_s1, %s2926_s9  ;;  %1845 = sst [smem:[#allocation14 + $0x2]] (%p2954_p13), %s2297_s14 }
  0x76   : > { %1846 = sst [smem:[#allocation14 + $0x3]] (%p2954_p13), %s2298_s0  ;;  %s2299_s11 = smov 4  }
  0x77   : > { %1847 = sst [smem:[#allocation14 + $0x4]] (%p2954_p13), %s2298_s0  ;;  %s2956_s5 = sand.u32 1, %s2289_s28  }
  0x78   : > { %s1564_s30 = sshll.u32 %s255_s27, 26  ;;  %1848 = sst [smem:[#allocation14 + $0x5]] (%p2954_p13), %s2299_s11 }
  0x79   : > { %s1565_s21 = sadd.s32 134217728, %s1564_s30  ;;  %s2568_s4 = scalar_lea.sflag [#allocation7], %s2956_s5 }
  0x7a   : > { %s2300_s15 = smov [#allocation13]   ;;  %s1836_s7 = smul.u32 3, %s2543_s8 }
  0x7b   : > { %1849 = dma.general (%p2954_p13), %s250_s6, 3072, %s264_s13, %s2568_s4, %s2300_s15, [#allocation14], %s1565_s21, 0  }
  0x7c   : > { %s1566_s14 = sshll.u32 %s2281_s26, 4  ;;  %s2957_s2 = sld [smem:[#allocation31_spill]] }
  0x7d   : > { %s290_s27 = scalar_lea.vmem [#allocation8], %s1836_s7 }
  0x7e   : > { %s296_s30 = sshll.u32 %s290_s27, 4  ;;  %s2580_s30 = int_to_ptr.vmem [resolvable:$true] %s296_s30 }
  0x82   : > { %s2578_s0 = scalar_lea.hbm %s2957_s2, %s1566_s14  ;;  %s2103_s21 = scalar_lea.hbm %s2957_s2, 192 }
  0x83   : > { %s2099_s11 = scalar_lea.hbm %s2578_s0, 48  ;;  %p2104_p4 = scmp.lt.u32.totalorder %s2578_s0, %s2957_s2 }
  0x84   : > { %p2100_p6 = scmp.ne.s32.totalorder %s2578_s0, %s2099_s11  ;;  %p2105_p11 = scmp.lt.u32.totalorder %s2103_s21, %s2099_s11 }
  0x85   : > { %p2107_p5 = scmp.lt.u32.totalorder %s2099_s11, %s2578_s0 }
  0x86   : > { %p2101_p2 = pnand %p2100_p6, %p2954_p13  ;;  %p2106_p0 = por %p2105_p11, %p2104_p4 }
  0x88   : > { %p2102_p7 = pneg %p2101_p2  ;;  %p2108_p8 = por %p2107_p5, %p2106_p0 }
  0x8a   : > { %p2109_p9 = pnand %p2108_p8, %p2102_p7 }
  0x8c   : > { %2112 = shalt.err (!%p2109_p9)
}
  0x8d   : > { %s2113_s5 = scalar_lea.vmem %s2580_s30, 48  ;;  %s2301_s15 = smov [#allocation8]  }
  0x8e   : > { %p2114_p1 = scmp.ne.s32.totalorder %s2580_s30, %s2113_s5  ;;  %s2117_s7 = sshll.u32 %s2301_s15, 4  ;;  %s2118_s7 = int_to_ptr.vmem [resolvable:$false] %s2117_s7 }
  0x8f   : > { %s2119_s14 = scalar_lea.vmem %s2118_s7, 96  ;;  %p2120_p10 = scmp.lt.s32.totalorder %s2580_s30, %s2118_s7 }
  0x90   : > { %p2115_p3 = pnand %p2114_p1, %p2954_p13  ;;  %p2121_p6 = scmp.lt.s32.totalorder %s2119_s14, %s2113_s5 }
  0x92   : > { %p2116_p12 = pneg %p2115_p3  ;;  %p2122_p2 = por %p2121_p6, %p2120_p10 }
  0x94   : > { %p2123_p4 = pnand %p2122_p2, %p2116_p12 }
  0x96   : > { %2126 = shalt.err (!%p2123_p4)
}
  0x97   : > { %s2302_s27 = smov 64   ;;  %s2303_s11 = smov 16  }
  0x98   : > { %s2304_s13 = smov 1   ;;  %s1567_s6 = sshll.u32 %s2543_s8, 6 }
  0x99   : > { %1850 = dma.hbm_to_vmem [thread:$0]  (%p2954_p13), %s2578_s0, 48, %s2580_s30, %s2568_s4, %s2302_s27, %s2303_s11, %s2304_s13  }
  0x9a   : > { %s2958_s21 = sshll.u32 %s2281_s26, 10  ;;  %s310_s15 = scalar_lea.vmem [#allocation9], %s1567_s6 }
  0x9b   : > { %s2610_s5 = scalar_lea.hbm %s2906_s3, %s2958_s21  ;;  %s317_s7 = sshll.u32 %s310_s15, 4  ;;  %s2612_s7 = int_to_ptr.vmem [resolvable:$true] %s317_s7 }
  0x9c   : > { %s2959_s14 = sand.u32 1, %s2289_s28   ;;  %s2127_s23 = scalar_lea.hbm %s2610_s5, 1024 }
  0x9d   : > { %s2616_s2 = scalar_lea.sflag [#allocation10], %s2959_s14  ;;  %p2128_p7 = scmp.ne.s32.totalorder %s2610_s5, %s2127_s23 }
  0x9e   : > { %s2131_s0 = scalar_lea.hbm %s2906_s3, 4096  ;;  %p2132_p5 = scmp.lt.u32.totalorder %s2610_s5, %s2906_s3 }
  0x9f   : > { %p2129_p11 = pnand %p2128_p7, %p2954_p13  ;;  %p2133_p8 = scmp.lt.u32.totalorder %s2131_s0, %s2127_s23 }
  0xa0   : > { %p2135_p1 = scmp.lt.u32.totalorder %s2127_s23, %s2610_s5 }
  0xa1   : > { %p2130_p0 = pneg %p2129_p11  ;;  %p2134_p9 = por %p2133_p8, %p2132_p5 }
  0xa3   : > { %p2136_p3 = por %p2135_p1, %p2134_p9 }
  0xa5   : > { %p2137_p12 = pnand %p2136_p3, %p2130_p0 }
  0xa7   : > { %2140 = shalt.err (!%p2137_p12)
}
  0xa8   : > { %s2141_s11 = scalar_lea.vmem %s2612_s7, 1024  ;;  %s2305_s13 = smov [#allocation9]  }
  0xa9   : > { %p2142_p10 = scmp.ne.s32.totalorder %s2612_s7, %s2141_s11  ;;  %s2145_s6 = sshll.u32 %s2305_s13, 4  ;;  %s2146_s6 = int_to_ptr.vmem [resolvable:$false] %s2145_s6 }
  0xaa   : > { %s2147_s21 = scalar_lea.vmem %s2146_s6, 2048  ;;  %p2148_p4 = scmp.lt.s32.totalorder %s2612_s7, %s2146_s6 }
  0xab   : > { %p2143_p6 = pnand %p2142_p10, %p2954_p13  ;;  %p2149_p7 = scmp.lt.s32.totalorder %s2147_s21, %s2141_s11 }
  0xad   : > { %p2144_p2 = pneg %p2143_p6  ;;  %p2150_p11 = por %p2149_p7, %p2148_p4 }
  0xaf   : > { %p2151_p5 = pnand %p2150_p11, %p2144_p2 }
  0xb1   : > { %2154 = shalt.err (!%p2151_p5)
}
  0xb2   : > { %s2960_s23 = smov 8   ;;  %s2961_s1 = smov 128  }
  0xb3   : > { %1851 = dma.hbm_to_vmem [thread:$0]  (%p2954_p13), %s2610_s5, 1024, %s2612_s7, %s2616_s2, %s2961_s1, %s2961_s1, %s2960_s23  }
  0xb4 PF: > { %p2962_p0 = scmp.ne.s32.totalorder %s2949_s10, 0 }
  0xb5   : > { %s2646_s9 = sand.u32 (!%p2962_p0), 1, %s2265_s22   ;;  %p2963_p8 = scmp.ne.s32.totalorder (!%p2962_p0), %s2939_s12, 0 }
  0xb6   : > { %329 = sbr.rel (%p2962_p0) target bundleno = 1521 (0x5f1), region = 40  ;;  %s1571_s15 = sshll.u32 (!%p2962_p0), %s2646_s9, 6 }
  0xb7   : > { %s332_s14 = scalar_lea.sflag (!%p2962_p0), [#allocation4], %s2646_s9  ;;  %s2650_s16 = scalar_lea.vmem (!%p2962_p0), [#allocation3], %s1571_s15 }
  0xbd   : > { %2228 = dma.done.wait (%p2963_p8), %s332_s14, 1024  }
  0xbe   : > { %2230 = vsyncadd (%p2963_p8), %s332_s14, 4294966272  ;;  %s340_s2 = sand.u32 1, %s2397_s29   ;;  %s342_s10 = sand.u32 1, %s2253_s19  }
  0xbf   : > { %s1837_s5 = smul.u32 192, %s342_s10  ;;  %s341_s7 = scalar_lea.sflag [#allocation7], %s340_s2 }
  0xc0   : > { %p2964_p13 = scmp.ne.s32.totalorder %s2943_s17, 0 }
  0xc1   : > { %s2658_s8 = scalar_lea.vmem [#allocation6], %s1837_s5 }
  0xc2   : > { %2232 = dma.done.wait (%p2964_p13), %s341_s7, 3120  }
  0xc3   : > { %2234 = vsyncadd (%p2964_p13), %s341_s7, 4294964176  ;;  %s1838_s4 = smul.u32 3, %s342_s10  ;;  %s1572_s0 = sshll.u32 %s342_s10, 6 }
  0xc4   : > { %s359_s12 = scalar_lea.sflag [#allocation10], %s340_s2  ;;  %s2666_s27 = scalar_lea.vmem [#allocation9], %s1572_s0 }
  0xc5   : > { %s2664_s30 = scalar_lea.vmem [#allocation8], %s1838_s4 }
  0xc6   : > { %2236 = dma.done.wait (%p2964_p13), %s359_s12, 1024  }
  0xc7   : > { %2238 = vsyncadd (%p2964_p13), %s359_s12, 4294966272  ;;  %p2965_p9 = scmp.eq.s32.totalorder %s2397_s29, 0 }
  0xc9   : > { %2240 = dma.done.wait (%p2965_p9), [#allocation10], 32   ;;  %p2966_p1 = pmov %p2965_p9 }
  0xca   : > { %s1574_s11 = sshll.u32 %s2646_s9, 7  ;;  %p1575_p3 = scmp.ne.s32.totalorder %s2273_s24, 0 }
  0xcb   : > { %2242 = vsyncadd (%p2966_p1), [#allocation10], 4294967264  ;;  %s2677_s13 = scalar_lea.vmem [#allocation12], %s1574_s11  ;;  %v2306_v0 = vmov (!%p1575_p3), 0.0  }
  0xcc   : > { %412 = sbr.rel (%p1575_p3) target bundleno = 212 (0xd4), region = 64  ;;  %413 = vst [vmem:[#allocation2] sm:$0xff] (!%p1575_p3), %v2306_v0  ;;  %414 = vst [vmem:[#allocation2 + $0x8] sm:$0xff] (!%p1575_p3), %v2306_v0 }
  0xcd   : > { %415 = vst [vmem:[#allocation2 + $0x10] sm:$0xff] (!%p1575_p3), %v2306_v0  ;;  %416 = vst [vmem:[#allocation2 + $0x18] sm:$0xff] (!%p1575_p3), %v2306_v0 }
  0xce   : > { %417 = vst [vmem:[#allocation2 + $0x20] sm:$0xff] (!%p1575_p3), %v2306_v0  ;;  %418 = vst [vmem:[#allocation2 + $0x28] sm:$0xff] (!%p1575_p3), %v2306_v0 }
  0xcf   : > { %419 = vst [vmem:[#allocation2 + $0x30] sm:$0xff] (!%p1575_p3), %v2306_v0  ;;  %420 = vst [vmem:[#allocation2 + $0x38] sm:$0xff] (!%p1575_p3), %v2306_v0 }
  0xd0   : > { %421 = vst [vmem:[#allocation2 + $0x40] sm:$0xff] (!%p1575_p3), %v2306_v0  ;;  %422 = vst [vmem:[#allocation2 + $0x48] sm:$0xff] (!%p1575_p3), %v2306_v0 }
  0xd1   : > { %423 = vst [vmem:[#allocation2 + $0x50] sm:$0xff] (!%p1575_p3), %v2306_v0  ;;  %424 = vst [vmem:[#allocation2 + $0x58] sm:$0xff] (!%p1575_p3), %v2306_v0 }
  0xd2   : > { %425 = vst [vmem:[#allocation2 + $0x60] sm:$0xff] (!%p1575_p3), %v2306_v0  ;;  %426 = vst [vmem:[#allocation2 + $0x68] sm:$0xff] (!%p1575_p3), %v2306_v0 }
  0xd3   : > { %427 = vst [vmem:[#allocation2 + $0x70] sm:$0xff] %v2306_v0  ;;  %428 = vst [vmem:[#allocation2 + $0x78] sm:$0xff] %v2306_v0 }
  0xd4 PF: > { %v1975_v1 = vld [vmem:[%s2658_s8 + $0x40] sm:$0xff]   ;;  %v1976_v2 = vld [vmem:[%s2658_s8 + $0x48] sm:$0xff]   ;;  %v1977_v3 = vld [vmem:[%s2658_s8 + $0x50] sm:$0xff]   ;;  %vm869_vm0 = vcmask 523264   ;;  %p1657_p12 = scmp.ne.s32.totalorder %s2273_s24, 3 }
  0xd5   : > { %1743 = vmatprep.subr.bf16.mxu1 %v1975_v1  ;;  %v1982_v4 = vld [vmem:[%s2658_s8] sm:$0xff]   ;;  %v1978_v5 = vld [vmem:[%s2658_s8 + $0x58] sm:$0xff]   ;;  %v1984_v6 = vld [vmem:[%s2658_s8 + $0x8] sm:$0xff]  }
  0xd6   : > { %1744 = vmatpush3.bf16.msra.mxu1 %v1975_v1  ;;  %1719 = vmatprep.subr.bf16.mxu0 %v1982_v4  ;;  %v429_v7 = vld [vmem:[%s2650_s16] sm:$0xff]  ;;  %v430_v8 = vld [vmem:[%s2650_s16 + $0x8] sm:$0xff]  ;;  %v1985_v11 = vld [vmem:[%s2658_s8 + $0x10] sm:$0xff]  }
  0xd7   : > { %1745 = vmatprep.subr.bf16.mxu1 %v1976_v2  ;;  %1720 = vmatpush3.bf16.msra.mxu0 %v1982_v4  ;;  %v1979_v9 = vld [vmem:[%s2658_s8 + $0x60] sm:$0xff]   ;;  %v437_v10 = vpack.c.bf16 %v430_v8, %v429_v7  ;;  %v1986_v12 = vld [vmem:[%s2658_s8 + $0x18] sm:$0xff]   ;;  %v1980_v13 = vld [vmem:[%s2658_s8 + $0x68] sm:$0xff]  }
  0xd8   : > { %1721 = vmatprep.subr.bf16.mxu0 %v1984_v6  ;;  %v1981_v14 = vld [vmem:[%s2658_s8 + $0x70] sm:$0xff]   ;;  %v1987_v15 = vld [vmem:[%s2658_s8 + $0x20] sm:$0xff]   ;;  %v1988_v16 = vld [vmem:[%s2658_s8 + $0x28] sm:$0xff]  }
  0xd9   : > { %1759 = vmatprep.mubr.bf16.mxu1 %v437_v10  ;;  %1735 = vmatprep.mubr.bf16.mxu0 %v437_v10  ;;  %v1983_v17 = vld [vmem:[%s2658_s8 + $0x78] sm:$0xff]   ;;  %v431_v18 = vld [vmem:[%s2650_s16 + $0x10] sm:$0xff]  ;;  %v433_v21 = vld [vmem:[%s2650_s16 + $0x20] sm:$0xff] }
  0xda   : > { %1746 = vmatpush3.bf16.msra.mxu1 %v1976_v2  ;;  %v432_v19 = vld [vmem:[%s2650_s16 + $0x18] sm:$0xff]  ;;  %v1989_v20 = vld [vmem:[%s2658_s8 + $0x30] sm:$0xff]   ;;  %v434_v22 = vld [vmem:[%s2650_s16 + $0x28] sm:$0xff] }
  0xdb   : > { %1747 = vmatprep.subr.bf16.mxu1 %v1977_v3  ;;  %1722 = vmatpush3.bf16.msra.mxu0 %v1984_v6  ;;  %v2701_v23 = vpack.c.bf16 %v432_v19, %v431_v18  ;;  %v2703_v24 = vpack.c.bf16 %v434_v22, %v433_v21  ;;  %v1990_v25 = vld [vmem:[%s2658_s8 + $0x38] sm:$0xff]   ;;  %v435_v26 = vld [vmem:[%s2650_s16 + $0x30] sm:$0xff]  ;;  %v1602_v30 = vld [vmem:[%s2664_s30 + $0x1] ss:$0 sm:$0xff] }
  0xdc   : > { %1723 = vmatprep.subr.bf16.mxu0 %v1985_v11  ;;  %v436_v27 = vld [vmem:[%s2650_s16 + $0x38] sm:$0xff]  ;;  %v1576_v39 = vld [vmem:[%s2664_s30] ss:$0 sm:$0xff]  ;;  %v1993_v21 = vld [vmem:[%s2658_s8 + $0x90] sm:$0xff]  }
  0xdd   : > { %v2710_v28 = vpack.c.bf16 %v436_v27, %v435_v26  ;;  %v1991_v19 = vld [vmem:[%s2658_s8 + $0x80] sm:$0xff]   ;;  %v1994_v22 = vld [vmem:[%s2658_s8 + $0x98] sm:$0xff]   ;;  %v1996_v26 = vld [vmem:[%s2658_s8 + $0xa8] sm:$0xff]  }
  0xde   : > { %1748 = vmatpush3.bf16.msra.mxu1 %v1977_v3  ;;  %v1997_v27 = vld [vmem:[%s2658_s8 + $0xb0] sm:$0xff]  }
  0xdf   : > { %1749 = vmatprep.subr.bf16.mxu1 %v1978_v5  ;;  %1724 = vmatpush3.bf16.msra.mxu0 %v1985_v11 }
  0xe0   : > { %1725 = vmatprep.subr.bf16.mxu0 %v1986_v12 }
  0xe2   : > { %1750 = vmatpush3.bf16.msra.mxu1 %v1978_v5 }
  0xe3   : > { %1751 = vmatprep.subr.bf16.mxu1 %v1979_v9  ;;  %1726 = vmatpush3.bf16.msra.mxu0 %v1986_v12 }
  0xe4   : > { %1727 = vmatprep.subr.bf16.mxu0 %v1987_v15 }
  0xe6   : > { %1752 = vmatpush3.bf16.msra.mxu1 %v1979_v9 }
  0xe7   : > { %1753 = vmatprep.subr.bf16.mxu1 %v1980_v13  ;;  %1728 = vmatpush3.bf16.msra.mxu0 %v1987_v15 }
  0xe8   : > { %1729 = vmatprep.subr.bf16.mxu0 %v1988_v16 }
  0xea   : > { %1754 = vmatpush3.bf16.msra.mxu1 %v1980_v13 }
  0xeb   : > { %1755 = vmatprep.subr.bf16.mxu1 %v1981_v14  ;;  %1730 = vmatpush3.bf16.msra.mxu0 %v1988_v16 }
  0xec   : > { %1731 = vmatprep.subr.bf16.mxu0 %v1989_v20 }
  0xee   : > { %1756 = vmatpush3.bf16.msra.mxu1 %v1981_v14 }
  0xef   : > { %1757 = vmatprep.subr.bf16.mxu1 %v1983_v17  ;;  %1732 = vmatpush3.bf16.msra.mxu0 %v1989_v20  ;;  %v1992_v20 = vld [vmem:[%s2658_s8 + $0x88] sm:$0xff]  }
  0xf0   : > { %1733 = vmatprep.subr.bf16.mxu0 %v1990_v25 }
  0xf2   : > { %1758 = vmatpush3.bf16.msra.mxu1 %v1983_v17 }
  0xf3   : > { %1734 = vmatpush3.bf16.msra.mxu0 %v1990_v25  ;;  %v1995_v25 = vld [vmem:[%s2658_s8 + $0xa0] sm:$0xff]  }
  0xf4   : > { %1767 = vmatprep.subr.bf16.mxu0 %v1991_v19 }
  0xf5   : > { %1760 = vmatmul.mubr.bf16.vlgmr.msra.gmra.mrb[0].mxu1 %v2701_v23 }
  0xf6   : > { %1763 = vmatprep.mubr.bf16.mxu1 %v2703_v24  ;;  %1736 = vmatmul.mubr.bf16.vlgmr.msra.gmra.mrb[0].mxu0 %v2701_v23 }
  0xf7   : > { %1739 = vmatprep.mubr.bf16.mxu0 %v2703_v24  ;;  %1768 = vmatpush3.bf16.msra.mxu0 %v1991_v19 }
  0xf8   : > { %1769 = vmatprep.subr.bf16.mxu0 %v1992_v20 }
  0xfb   : > { %1770 = vmatpush3.bf16.msra.mxu0 %v1992_v20 }
  0xfc   : > { %1771 = vmatprep.subr.bf16.mxu0 %v1993_v21 }
  0xfd   : > { %1764 = vmatmul.mubr.bf16.gmra.mrb[4].mxu1 %v2710_v28 }
  0xfe   : > { %1740 = vmatmul.mubr.bf16.gmra.mrb[4].mxu0 %v2710_v28 }
  0xff   : > { %1783 = vmatprep.mubr.bf16.mxu0 %v437_v10  ;;  %1772 = vmatpush3.bf16.msra.mxu0 %v1993_v21 }
 0x100   : > { %1773 = vmatprep.subr.bf16.mxu0 %v1994_v22 }
 0x103   : > { %1774 = vmatpush3.bf16.msra.mxu0 %v1994_v22 }
 0x104   : > { %1775 = vmatprep.subr.bf16.mxu0 %v1995_v25 }
 0x107   : > { %1776 = vmatpush3.bf16.msra.mxu0 %v1995_v25 }
 0x108   : > { %1777 = vmatprep.subr.bf16.mxu0 %v1996_v26 }
 0x10b   : > { %1778 = vmatpush3.bf16.msra.mxu0 %v1996_v26 }
 0x10c   : > { %1779 = vmatprep.subr.bf16.mxu0 %v1997_v27 }
 0x10f   : > { %1780 = vmatpush3.bf16.msra.mxu0 %v1997_v27 }
 0x1c8   : > { %v1761_v29 = vpop.f32.mrb[0].mxu1 }
 0x1c9   : > { %v684_v31 = vpop.f32.mrb[1].mxu1  ;;  %v693_v33 = vadd.f32 %v1761_v29, %v1602_v30  ;;  %v1737_v41 = vpop.f32.mrb[0].mxu0  ;;  %v1998_v29 = vld [vmem:[%s2658_s8 + $0xb8] sm:$0xff]  }
 0x1ca   : > { %v1762_v32 = vpop.f32.mrb[2].mxu1  ;;  %v685_v36 = vadd.f32 %v1602_v30, %v684_v31  ;;  %v555_v44 = vadd.f32 %v1737_v41, %v1576_v39  ;;  %v546_v45 = vpop.f32.mrb[1].mxu0  ;;  %1781 = vmatprep.subr.bf16.mxu0 %v1998_v29 }
 0x1cb   : > { %v696_v34 = vadd.f32 %v1762_v32, %v1602_v30  ;;  %v687_v35 = vpop.f32.mrb[3].mxu1  ;;  %v547_v48 = vadd.f32 %v1576_v39, %v546_v45  ;;  %v1738_v49 = vpop.f32.mrb[2].mxu0  ;;  %1782 = vmatpush3.bf16.msra.mxu0 %v1998_v29 }
 0x1cc   : > { %v688_v37 = vadd.f32 %v1602_v30, %v687_v35  ;;  %v855_v52 = vmul.f32 0.125, %v555_v44  ;;  %v558_v53 = vadd.f32 %v1738_v49, %v1576_v39  ;;  %v549_v54 = vpop.f32.mrb[3].mxu0 }
 0x1cd   : > { %v866_v38 = vpack.c.bf16 %v696_v34, %v693_v33  ;;  %v853_v57 = vmul.f32 0.125, %v547_v48  ;;  %v550_v58 = vadd.f32 %v1576_v39, %v549_v54 }
 0x1ce   : > { %v865_v40 = vpack.c.bf16 %v688_v37, %v685_v36  ;;  %v856_v60 = vmul.f32 0.125, %v558_v53  ;;  %1784 = vmatmul.mubr.bf16.vlgmr.msra.gmra.mrb[8].mxu0 %v2701_v23 }
 0x1cf   : > { %v854_v62 = vmul.f32 0.125, %v550_v58  ;;  %v886_v3 = vsel %vm869_vm0, %v866_v38, 0  ;;  %1787 = vmatprep.mubr.bf16.mxu0 %v2703_v24 }
 0x1d0   : > { %1831 = vmatprep.subr.msk.bf16.mxu1 %vm869_vm0, %v865_v40  ;;  %v883_v42 = vsel %vm869_vm0, %v865_v40, 0  ;;  %v1765_v43 = vpop.f32.mrb[4].mxu1  ;;  %v862_v0 = vpack.c.bf16 %v856_v60, %v855_v52 }
 0x1d1   : > { %1792 = vmatpush3.bf16.xpose.msra.mxu1 %v883_v42  ;;  %v709_v46 = vadd.f32 %v1765_v43, %v1602_v30  ;;  %v700_v47 = vpop.f32.mrb[5].mxu1  ;;  %v861_v1 = vpack.c.bf16 %v854_v62, %v853_v57  ;;  %v1741_v2 = vpop.f32.mrb[4].mxu0  ;;  %v2750_v43 = vld [vmem:[%s2664_s30 + $0x2] ss:$0 sm:$0xff] }
 0x1d2   : > { %1832 = vmatprep.subr.msk.bf16.mxu1 %vm869_vm0, %v866_v38  ;;  %v701_v50 = vadd.f32 %v1602_v30, %v700_v47  ;;  %v1766_v51 = vpop.f32.mrb[6].mxu1  ;;  %v571_v4 = vadd.f32 %v1741_v2, %v1576_v39  ;;  %v562_v5 = vpop.f32.mrb[5].mxu0 }
 0x1d3   : > { %v712_v55 = vadd.f32 %v1766_v51, %v1602_v30  ;;  %v703_v56 = vpop.f32.mrb[7].mxu1  ;;  %1799 = vmatprep.mubr.msk.bf16.mxu1 %vm869_vm0, %v861_v1  ;;  %v563_v6 = vadd.f32 %v1576_v39, %v562_v5  ;;  %v1742_v7 = vpop.f32.mrb[6].mxu0 }
 0x1d4   : > { %v704_v59 = vadd.f32 %v1602_v30, %v703_v56  ;;  %v859_v8 = vmul.f32 0.125, %v571_v4  ;;  %v574_v9 = vadd.f32 %v1742_v7, %v1576_v39  ;;  %v565_v10 = vpop.f32.mrb[7].mxu0 }
 0x1d5   : > { %v868_v61 = vpack.c.bf16 %v712_v55, %v709_v46  ;;  %v857_v11 = vmul.f32 0.125, %v563_v6  ;;  %v566_v12 = vadd.f32 %v1576_v39, %v565_v10 }
 0x1d6   : > { %v867_v63 = vpack.c.bf16 %v704_v59, %v701_v50  ;;  %v860_v13 = vmul.f32 0.125, %v574_v9  ;;  %1788 = vmatmul.mubr.bf16.gmra.mrb[12].mxu0 %v2710_v28 }
 0x1d7   : > { %v858_v14 = vmul.f32 0.125, %v566_v12  ;;  %v892_v18 = vsel %vm869_vm0, %v868_v61, 0 }
 0x1d8   : > { %v864_v15 = vpack.c.bf16 %v860_v13, %v859_v8  ;;  %v889_v17 = vsel %vm869_vm0, %v867_v63, 0 }
 0x1d9   : > { %1794 = vmatpush3.bf16.xpose.msra.mxu1 %v886_v3  ;;  %v863_v16 = vpack.c.bf16 %v858_v14, %v857_v11 }
 0x1da   : > { %1833 = vmatprep.subr.msk.bf16.mxu1 %vm869_vm0, %v867_v63 }
 0x1e1   : > { %1796 = vmatpush3.bf16.xpose.msra.mxu1 %v889_v17 }
 0x1e2   : > { %1834 = vmatprep.subr.msk.bf16.mxu1 %vm869_vm0, %v868_v61 }
 0x1e9   : > { %1798 = vmatpush3.bf16.xpose.msra.mxu1 %v892_v18 }
 0x1f0   : > { %1800 = vmatmul.mubr.msk.bf16.vlgmr.msra.gmra.mrb[8].mxu1 %vm869_vm0, %v862_v0 }
 0x1f1   : > { %1803 = vmatprep.mubr.msk.bf16.mxu1 %vm869_vm0, %v863_v16 }
 0x1f8   : > { %1804 = vmatmul.mubr.msk.bf16.gmra.mrb[12].mxu1 %vm869_vm0, %v864_v15 }
 0x2a1   : > { %v1785_v44 = vpop.f32.mrb[8].mxu0 }
 0x2a2   : > { %v831_v45 = vadd.f32 %v1785_v44, %v2750_v43  ;;  %v822_v46 = vpop.f32.mrb[9].mxu0  ;;  %v2002_v44 = vld [vmem:[%s2666_s27 + $0x10] ss:$8 sps:$4 sm:$0xff]  }
 0x2a3   : > { %v823_v47 = vadd.f32 %v2750_v43, %v822_v46  ;;  %v1786_v48 = vpop.f32.mrb[10].mxu0  ;;  %v2005_v46 = vld [vmem:[%s2666_s27 + $0x20] ss:$8 sps:$4 sm:$0xff]  }
 0x2a4   : > { %v834_v49 = vadd.f32 %v1786_v48, %v2750_v43  ;;  %v825_v50 = vpop.f32.mrb[11].mxu0 }
 0x2a5   : > { %v826_v51 = vadd.f32 %v2750_v43, %v825_v50 }
 0x2a6   : > { %v1052_v52 = vpack.c.bf16 %v834_v49, %v831_v45  ;;  %v2007_v45 = vld [vmem:[%s2666_s27 + $0x24] ss:$8 sps:$4 sm:$0xff]  }
 0x2a7   : > { %v1051_v53 = vpack.c.bf16 %v826_v51, %v823_v47 }
 0x2a9   : > { %v1789_v54 = vpop.f32.mrb[12].mxu0  ;;  %1807 = vmatprep.subr.bf16.mxu0 %v1051_v53 }
 0x2aa   : > { %v838_v56 = vpop.f32.mrb[13].mxu0  ;;  %1808 = vmatpush3.bf16.msra.mxu0 %v1051_v53 }
 0x2ab   : > { %1809 = vmatprep.subr.bf16.mxu0 %v1052_v52 }
 0x2ae   : > { %1810 = vmatpush3.bf16.msra.mxu0 %v1052_v52 }
 0x2c3   : > { %v1801_v30 = vpop.f32.mrb[8].mxu1 }
 0x2c4   : > { %v928_v31 = vpop.f32.mrb[9].mxu1  ;;  %v965_v32 = vsel %vm869_vm0, %v1801_v30, -inf }
 0x2c5   : > { %966 = vmax.xlane.f32.xlu1 %v965_v32  ;;  %v1802_v33 = vpop.f32.mrb[10].mxu1  ;;  %v959_v34 = vsel %vm869_vm0, %v928_v31, -inf }
 0x2c6   : > { %960 = vmax.xlane.f32.xlu0 %v959_v34  ;;  %v931_v35 = vpop.f32.mrb[11].mxu1  ;;  %v968_v36 = vsel %vm869_vm0, %v1802_v33, -inf  ;;  %v847_v34 = vadd.f32 %v1789_v54, %v2750_v43 }
 0x2c7   : > { %v962_v23 = vsel %vm869_vm0, %v931_v35, -inf }
 0x2c9   : > { %969 = vmax.xlane.f32.xlu1 %v968_v36  ;;  %v1790_v36 = vpop.f32.mrb[14].mxu0 }
 0x2ca   : > { %963 = vmax.xlane.f32.xlu0 %v962_v23 }
 0x2cb   : > { %v1805_v24 = vpop.f32.mrb[12].mxu1 }
 0x2cc   : > { %v944_v37 = vpop.f32.mrb[13].mxu1  ;;  %v977_v41 = vsel %vm869_vm0, %v1805_v24, -inf }
 0x2cd   : > { %v1806_v28 = vpop.f32.mrb[14].mxu1  ;;  %v971_v38 = vsel %vm869_vm0, %v944_v37, -inf }
 0x2ce   : > { %972 = vmax.xlane.f32.xlu0 %v971_v38  ;;  %v947_v39 = vpop.f32.mrb[15].mxu1  ;;  %v980_v42 = vsel %vm869_vm0, %v1806_v28, -inf }
 0x2cf   : > { %v974_v40 = vsel %vm869_vm0, %v947_v39, -inf }
 0x2d0   : > { %975 = vmax.xlane.f32.xlu1 %v974_v40  ;;  %v1999_v40 = vld [vmem:[%s2666_s27] ss:$8 sps:$4 sm:$0xff]  }
 0x2d2   : > { %978 = vmax.xlane.f32.xlu0 %v977_v41  ;;  %v2001_v41 = vld [vmem:[%s2666_s27 + $0x4] ss:$8 sps:$4 sm:$0xff]  }
 0x2d3   : > { %1823 = vmatprep.subr.bf16.mxu1 %v2001_v41 }
 0x2d4   : > { %981 = vmax.xlane.f32.xlu1 %v980_v42  ;;  %v2004_v42 = vld [vmem:[%s2666_s27 + $0x14] ss:$8 sps:$4 sm:$0xff]   ;;  %1827 = vmatpush1.bf16.msra.mxu1 %v1999_v40 }
 0x2d5   : > { %1824 = vmatprep.subr.bf16.mxu1 %v2004_v42 }
 0x2d8   : > { %1828 = vmatpush1.bf16.msra.mxu1 %v2002_v44 }
 0x2d9   : > { %1825 = vmatprep.subr.bf16.mxu1 %v2007_v45 }
 0x2dc   : > { %1829 = vmatpush1.bf16.msra.mxu1 %v2005_v46 }
 0x352   : > { %v967_v55 = vpop.xlane.xlu1 %966 }
 0x353   : > { %v985_v57 = vsub.f32 %v1801_v30, %v967_v55  ;;  %v961_v58 = vpop.xlane.xlu0 %960 }
 0x354   : > { %v983_v59 = vsub.f32 %v928_v31, %v961_v58 }
 0x355   : > { %v995_v60 = vmul.f32 1.442695, %v985_v57 }
 0x356   : > { %v991_v61 = vmul.f32 1.442695, %v983_v59  ;;  %v970_v62 = vpop.xlane.xlu1 %969 }
 0x357   : > { %v986_v63 = vsub.f32 %v1802_v33, %v970_v62  ;;  %v964_v0 = vpop.xlane.xlu0 %963 }
 0x358   : > { %2011 = vpow2.f32 %v991_v61  ;;  %v984_v1 = vsub.f32 %v931_v35, %v964_v0  ;;  %v839_v35 = vadd.f32 %v2750_v43, %v838_v56 }
 0x359   : > { %2013 = vpow2.f32 %v995_v60  ;;  %v997_v2 = vmul.f32 1.442695, %v986_v63 }
 0x35a   : > { %v993_v3 = vmul.f32 1.442695, %v984_v1 }
 0x35b   : > { %v973_v4 = vpop.xlane.xlu0 %972 }
 0x35c   : > { %2015 = vpow2.f32 %v993_v3  ;;  %v987_v5 = vsub.f32 %v944_v37, %v973_v4  ;;  %v841_v37 = vpop.f32.mrb[15].mxu0 }
 0x35d   : > { %v976_v6 = vpop.xlane.xlu1 %975  ;;  %2017 = vpow2.f32 %v997_v2 }
 0x35e   : > { %v999_v7 = vmul.f32 1.442695, %v987_v5  ;;  %v988_v8 = vsub.f32 %v947_v39, %v976_v6 }
 0x35f   : > { %v979_v9 = vpop.xlane.xlu0 %978 }
 0x360   : > { %2019 = vpow2.f32 %v999_v7  ;;  %v1001_v10 = vmul.f32 1.442695, %v988_v8  ;;  %v989_v11 = vsub.f32 %v1805_v24, %v979_v9  ;;  %v850_v24 = vadd.f32 %v1790_v36, %v2750_v43 }
 0x361   : > { %v982_v12 = vpop.xlane.xlu1 %981 }
 0x362   : > { %v2756_v13 = vpop.eup %2011  ;;  %2021 = vpow2.f32 %v1001_v10  ;;  %v1003_v14 = vmul.f32 1.442695, %v989_v11  ;;  %v990_v15 = vsub.f32 %v1806_v28, %v982_v12  ;;  %v842_v28 = vadd.f32 %v2750_v43, %v841_v37  ;;  %v2010_v10 = vld [vmem:[%s2666_s27 + $0x34] ss:$8 sps:$4 sm:$0xff]   ;;  %v2008_v11 = vld [vmem:[%s2666_s27 + $0x30] ss:$8 sps:$4 sm:$0xff]  }
 0x363   : > { %v1007_v16 = vsel %vm869_vm0, %v2756_v13, 0.0  ;;  %v2760_v17 = vpop.eup %2013  ;;  %v1054_v38 = vpack.c.bf16 %v850_v24, %v847_v34  ;;  %1826 = vmatprep.subr.bf16.mxu1 %v2010_v10  ;;  %v2307_v12 = vmov 0   ;;  %v1139_v24 = vld [vmem:[#allocation2 + $0x38] sm:$0xff] }
 0x364   : > { %2023 = vpow2.f32 %v1003_v14  ;;  %v1005_v18 = vmul.f32 1.442695, %v990_v15  ;;  %1008 = vadd.xlane.f32.xlu0 %v1007_v16  ;;  %v1013_v20 = vsel %vm869_vm0, %v2760_v17, 0.0  ;;  %v1053_v39 = vpack.c.bf16 %v842_v28, %v839_v35  ;;  %1830 = vmatpush1.bf16.msra.mxu1 %v2008_v11 }
 0x365   : > { %1254 = vmatprep.mubr.bf16.mxu1 %v2307_v12 }
 0x366   : > { %v2762_v19 = vpop.eup %2015  ;;  %2025 = vpow2.f32 %v1005_v18  ;;  %1811 = vmatprep.subr.bf16.mxu0 %v1053_v39 }
 0x367   : > { %v1010_v21 = vsel %vm869_vm0, %v2762_v19, 0.0  ;;  %v2768_v22 = vpop.eup %2017  ;;  %1812 = vmatpush3.bf16.msra.mxu0 %v1053_v39 }
 0x368   : > { %1014 = vadd.xlane.f32.xlu0 %v1013_v20  ;;  %1011 = vadd.xlane.f32.xlu1 %v1010_v21  ;;  %v1016_v27 = vsel %vm869_vm0, %v2768_v22, 0.0 }
 0x369   : > { %1813 = vmatprep.subr.bf16.mxu0 %v1054_v38 }
 0x36a   : > { %v2770_v25 = vpop.eup %2019 }
 0x36b   : > { %v1019_v26 = vsel %vm869_vm0, %v2770_v25, 0.0  ;;  %1814 = vmatpush3.bf16.msra.mxu0 %v1054_v38 }
 0x36c   : > { %v2776_v29 = vpop.eup %2021  ;;  %1020 = vadd.xlane.f32.xlu0 %v1019_v26  ;;  %1017 = vadd.xlane.f32.xlu1 %v1016_v27  ;;  %v1136_v27 = vld [vmem:[#allocation2 + $0x20] sm:$0xff] }
 0x36d   : > { %v1022_v32 = vsel %vm869_vm0, %v2776_v29, 0.0  ;;  %1212 = vmatprep.subr.bf16.mxu0 %v2001_v41 }
 0x36e   : > { %v2778_v30 = vpop.eup %2023 }
 0x36f   : > { %v1025_v31 = vsel %vm869_vm0, %v2778_v30, 0.0 }
 0x370   : > { %v2784_v33 = vpop.eup %2025  ;;  %1026 = vadd.xlane.f32.xlu0 %v1025_v31  ;;  %1023 = vadd.xlane.f32.xlu1 %v1022_v32  ;;  %v1133_v32 = vld [vmem:[#allocation2 + $0x8] sm:$0xff] }
 0x371   : > { %v1028_v23 = vsel %vm869_vm0, %v2784_v33, 0.0 }
 0x374   : > { %1029 = vadd.xlane.f32.xlu1 %v1028_v23  ;;  %v1134_v23 = vld [vmem:[#allocation2 + $0x10] sm:$0xff] }
 0x3f1   : > { %v1009_v43 = vpop.xlane.xlu0 %1008 }
 0x3f2   : > { %2027 = vrcp.f32 %v1009_v43 }
 0x3f5   : > { %v1015_v47 = vpop.xlane.xlu0 %1014  ;;  %v1012_v48 = vpop.xlane.xlu1 %1011 }
 0x3f6   : > { %2029 = vrcp.f32 %v1012_v48 }
 0x3f7   : > { %2031 = vrcp.f32 %v1015_v47 }
 0x3f9   : > { %v1021_v49 = vpop.xlane.xlu0 %1020  ;;  %v1018_v50 = vpop.xlane.xlu1 %1017 }
 0x3fa   : > { %2033 = vrcp.f32 %v1018_v50  ;;  %v1141_v50 = vld [vmem:[#allocation2 + $0x48] sm:$0xff] }
 0x3fb   : > { %2035 = vrcp.f32 %v1021_v49  ;;  %v1140_v49 = vld [vmem:[#allocation2 + $0x40] sm:$0xff] }
 0x3fc   : > { %v2028_v53 = vpop.eup %2027 }
 0x3fd   : > { %v1027_v51 = vpop.xlane.xlu0 %1026  ;;  %v1024_v52 = vpop.xlane.xlu1 %1023  ;;  %v1039_v56 = vmul.f32 %v2028_v53, %v2756_v13 }
 0x3fe   : > { %2037 = vrcp.f32 %v1024_v52  ;;  %v1142_v52 = vld [vmem:[#allocation2 + $0x50] sm:$0xff] }
 0x3ff   : > { %2039 = vrcp.f32 %v1027_v51 }
 0x400   : > { %v2030_v54 = vpop.eup %2029 }
 0x401   : > { %v1030_v55 = vpop.xlane.xlu1 %1029  ;;  %v1040_v57 = vmul.f32 %v2030_v54, %v2762_v19  ;;  %v2032_v58 = vpop.eup %2031 }
 0x402   : > { %2041 = vrcp.f32 %v1030_v55  ;;  %v1041_v61 = vmul.f32 %v2032_v58, %v2760_v17  ;;  %v1143_v55 = vld [vmem:[#allocation2 + $0x58] sm:$0xff] }
 0x403   : > { %v1047_v59 = vpack.c.bf16 %v1040_v57, %v1039_v56 }
 0x404   : > { %v2034_v60 = vpop.eup %2033 }
 0x405   : > { %v1042_v62 = vmul.f32 %v2034_v60, %v2768_v22  ;;  %1815 = vmatprep.mubr.msk.bf16.mxu0 %vm869_vm0, %v1047_v59  ;;  %v2036_v63 = vpop.eup %2035 }
 0x406   : > { %v1043_v3 = vmul.f32 %v2036_v63, %v2770_v25 }
 0x407   : > { %v1048_v0 = vpack.c.bf16 %v1042_v62, %v1041_v61  ;;  %v1144_v61 = vld [vmem:[#allocation2 + $0x60] sm:$0xff]  ;;  %v1145_v62 = vld [vmem:[#allocation2 + $0x68] sm:$0xff] }
 0x408   : > { %v2038_v1 = vpop.eup %2037 }
 0x409   : > { %v2040_v2 = vpop.eup %2039  ;;  %1816 = vmatmul.mubr.msk.bf16.vlgmr.msra.gmra.mrb[16].mxu0 %vm869_vm0, %v1048_v0  ;;  %v1044_v4 = vmul.f32 %v2038_v1, %v2776_v29  ;;  %v1132_v29 = vld [vmem:[#allocation2] sm:$0xff]  ;;  %v1146_v0 = vld [vmem:[#allocation2 + $0x70] sm:$0xff] }
 0x40a   : > { %1213 = vmatpush1.bf16.msra.mxu0 %v1999_v40  ;;  %v1045_v7 = vmul.f32 %v2040_v2, %v2778_v30  ;;  %v1137_v30 = vld [vmem:[#allocation2 + $0x28] sm:$0xff]  ;;  %v1135_v40 = vld [vmem:[#allocation2 + $0x18] sm:$0xff] }
 0x40b   : > { %v1049_v6 = vpack.c.bf16 %v1044_v4, %v1043_v3  ;;  %1214 = vmatprep.subr.bf16.mxu0 %v2004_v42  ;;  %v1147_v3 = vld [vmem:[#allocation2 + $0x78] sm:$0xff] }
 0x40c   : > { %v2042_v5 = vpop.eup %2041 }
 0x40d   : > { %v1046_v8 = vmul.f32 %v2042_v5, %v2784_v33  ;;  %1819 = vmatprep.mubr.msk.bf16.mxu0 %vm869_vm0, %v1049_v6  ;;  %v1138_v33 = vld [vmem:[#allocation2 + $0x30] sm:$0xff] }
 0x40e   : > { %1215 = vmatpush1.bf16.msra.mxu0 %v2002_v44 }
 0x40f   : > { %v1050_v9 = vpack.c.bf16 %v1046_v8, %v1045_v7  ;;  %1216 = vmatprep.subr.bf16.mxu0 %v2007_v45 }
 0x411   : > { %1820 = vmatmul.mubr.msk.bf16.gmra.mrb[20].mxu0 %vm869_vm0, %v1050_v9  ;;  %v1339_v9 = vlaneseq (!%p1657_p12) }
 0x412   : > { %1217 = vmatpush1.bf16.msra.mxu0 %v2005_v46  ;;  %1244 = vmatprep.mubr.bf16.mxu0 %v2307_v12 }
 0x413   : > { %1218 = vmatprep.subr.bf16.mxu0 %v2010_v10  ;;  %v1340_v10 = vshrl.u32 (!%p1657_p12), %v1339_v9, 7 }
 0x416   : > { %1219 = vmatpush1.bf16.msra.mxu0 %v2008_v11 }
 0x4dc   : > { %v1817_v13 = vpop.f32.mrb[16].mxu0 }
 0x4dd   : > { %v1101_v14 = vpop.f32.mrb[17].mxu0 }
 0x4de   : > { %v1818_v15 = vpop.f32.mrb[18].mxu0 }
 0x4df   : > { %v1149_v16 = vpack.c.bf16 %v1818_v15, %v1817_v13  ;;  %v1104_v17 = vpop.f32.mrb[19].mxu0  ;;  %v1341_v13 = vsub.s32 (!%p1657_p12), 0, %v1340_v10  ;;  %v1345_v15 = vsub.s32 (!%p1657_p12), 1, %v1340_v10 }
 0x4e0   : > { %v1148_v18 = vpack.c.bf16 %v1104_v17, %v1101_v14 }
 0x4e1   : > { %1654 = vmatmul.mubr.msk.bf16.vlgmr.msra.gmra.mrb[16].mxu1 %vm869_vm0, %v1149_v16 }
 0x4e2   : > { %1653 = vmatmul.mubr.msk.bf16.vlgmr.msra.gmra.mrb[24].mxu0 %vm869_vm0, %v1148_v18  ;;  %1264 = vmatprep.mubr.bf16.mxu1 %v2307_v12 }
 0x4e4   : > { %v1821_v19 = vpop.f32.mrb[20].mxu0 }
 0x4e5   : > { %v1117_v20 = vpop.f32.mrb[21].mxu0 }
 0x4e6   : > { %v1822_v21 = vpop.f32.mrb[22].mxu0 }
 0x4e7   : > { %v1151_v22 = vpack.c.bf16 %v1822_v21, %v1821_v19  ;;  %v1120_v25 = vpop.f32.mrb[23].mxu0 }
 0x4e8   : > { %v1150_v26 = vpack.c.bf16 %v1120_v25, %v1117_v20 }
 0x4ea   : > { %1655 = vmatmul.mubr.msk.bf16.gmra.mrb[20].mxu1 %vm869_vm0, %v1150_v26 }
 0x4eb   : > { %1274 = vmatprep.mubr.bf16.mxu1 %v2307_v12  ;;  %v1337_v12 = vld [vmem:[#allocation11] sm:$0x3] (!%p1657_p12) }
 0x4ec   : > { %v1342_v21 = vrot.slane (!%p1657_p12), %v1337_v12, %v1341_v13 }
 0x4f2   : > { %1656 = vmatmul.mubr.msk.bf16.gmra.mrb[24].mxu1 %vm869_vm0, %v1151_v22  ;;  %v1346_v22 = vrot.slane (!%p1657_p12), %v1337_v12, %v1345_v15 }
 0x5b4   : > { %v1256_v31 = vpop.f32.mrb[16].mxu1 }
 0x5b5   : > { %v1289_v34 = vadd.f32 %v1256_v31, %v1136_v27  ;;  %v1246_v35 = vpop.f32.mrb[24].mxu0  ;;  %v1258_v36 = vpop.f32.mrb[17].mxu1 }
 0x5b6   : > { %v1285_v37 = vadd.f32 %v1246_v35, %v1132_v29  ;;  %v1290_v28 = vadd.f32 %v1258_v36, %v1137_v30  ;;  %v1248_v38 = vpop.f32.mrb[25].mxu0  ;;  %v1260_v39 = vpop.f32.mrb[18].mxu1 }
 0x5b7   : > { %1305 = vst [vmem:[#allocation2 + $0x20] sm:$0xff] %v1289_v34  ;;  %v1286_v41 = vadd.f32 %v1248_v38, %v1133_v32  ;;  %v1291_v42 = vadd.f32 %v1260_v39, %v1138_v33  ;;  %v1250_v44 = vpop.f32.mrb[26].mxu0  ;;  %v1262_v45 = vpop.f32.mrb[19].mxu1 }
 0x5b8   : > { %1301 = vst [vmem:[#allocation2] sm:$0xff] %v1285_v37  ;;  %1306 = vst [vmem:[#allocation2 + $0x28] sm:$0xff] %v1290_v28  ;;  %v1287_v46 = vadd.f32 %v1250_v44, %v1134_v23  ;;  %v1292_v43 = vadd.f32 %v1262_v45, %v1139_v24  ;;  %v1252_v47 = vpop.f32.mrb[27].mxu0 }
 0x5b9   : > { %1302 = vst [vmem:[#allocation2 + $0x8] sm:$0xff] %v1286_v41  ;;  %1307 = vst [vmem:[#allocation2 + $0x30] sm:$0xff] %v1291_v42  ;;  %v1288_v48 = vadd.f32 %v1252_v47, %v1135_v40 }
 0x5ba   : > { %1303 = vst [vmem:[#allocation2 + $0x10] sm:$0xff] %v1287_v46  ;;  %1308 = vst [vmem:[#allocation2 + $0x38] sm:$0xff] %v1292_v43 }
 0x5bb   : > { %1304 = vst [vmem:[#allocation2 + $0x18] sm:$0xff] %v1288_v48 }
 0x5bd   : > { %v1266_v51 = vpop.f32.mrb[20].mxu1 }
 0x5be   : > { %v1293_v53 = vadd.f32 %v1266_v51, %v1140_v49  ;;  %v1268_v54 = vpop.f32.mrb[21].mxu1  ;;  %v1325_v18 = vld [vmem:[#allocation2 + $0x20] sm:$0xff] (!%p1657_p12) }
 0x5bf   : > { %v1294_v56 = vadd.f32 %v1268_v54, %v1141_v50  ;;  %v1270_v57 = vpop.f32.mrb[22].mxu1  ;;  %v1321_v11 = vld [vmem:[#allocation2] sm:$0xff] (!%p1657_p12)  ;;  %v1326_v19 = vld [vmem:[#allocation2 + $0x28] sm:$0xff] (!%p1657_p12)  ;;  %v1353_v37 = vadd.f32 (!%p1657_p12), %v1342_v21, %v1325_v18 }
 0x5c0   : > { %1309 = vst [vmem:[#allocation2 + $0x40] sm:$0xff] %v1293_v53  ;;  %v1295_v58 = vadd.f32 %v1270_v57, %v1142_v52  ;;  %v1272_v59 = vpop.f32.mrb[23].mxu1  ;;  %v1322_v14 = vld [vmem:[#allocation2 + $0x8] sm:$0xff] (!%p1657_p12)  ;;  %v1327_v20 = vld [vmem:[#allocation2 + $0x30] sm:$0xff] (!%p1657_p12)  ;;  %v1349_v32 = vadd.f32 (!%p1657_p12), %v1342_v21, %v1321_v11  ;;  %v1354_v28 = vadd.f32 (!%p1657_p12), %v1346_v22, %v1326_v19 }
 0x5c1   : > { %1310 = vst [vmem:[#allocation2 + $0x48] sm:$0xff] %v1294_v56  ;;  %v1296_v60 = vadd.f32 %v1272_v59, %v1143_v55  ;;  %v1323_v16 = vld [vmem:[#allocation2 + $0x10] sm:$0xff] (!%p1657_p12)  ;;  %v1328_v25 = vld [vmem:[#allocation2 + $0x38] sm:$0xff] (!%p1657_p12)  ;;  %v1350_v33 = vadd.f32 (!%p1657_p12), %v1346_v22, %v1322_v14  ;;  %v1355_v38 = vadd.f32 (!%p1657_p12), %v1342_v21, %v1327_v20  ;;  %1369 = vst [vmem:[%s2677_s13 + $0x20] sm:$0xff] (!%p1657_p12), %v1353_v37 }
 0x5c2   : > { %1311 = vst [vmem:[#allocation2 + $0x50] sm:$0xff] %v1295_v58  ;;  %v1324_v17 = vld [vmem:[#allocation2 + $0x18] sm:$0xff] (!%p1657_p12)  ;;  %v1351_v34 = vadd.f32 (!%p1657_p12), %v1342_v21, %v1323_v16  ;;  %v1356_v39 = vadd.f32 (!%p1657_p12), %v1346_v22, %v1328_v25  ;;  %1365 = vst [vmem:[%s2677_s13] sm:$0xff] (!%p1657_p12), %v1349_v32 }
 0x5c3   : > { %1312 = vst [vmem:[#allocation2 + $0x58] sm:$0xff] %v1296_v60  ;;  %v1352_v35 = vadd.f32 (!%p1657_p12), %v1346_v22, %v1324_v17  ;;  %1366 = vst [vmem:[%s2677_s13 + $0x8] sm:$0xff] (!%p1657_p12), %v1350_v33 }
 0x5c4   : > { %1367 = vst [vmem:[%s2677_s13 + $0x10] sm:$0xff] (!%p1657_p12), %v1351_v34  ;;  %1370 = vst [vmem:[%s2677_s13 + $0x28] sm:$0xff] (!%p1657_p12), %v1354_v28 }
 0x5c5   : > { %v1276_v63 = vpop.f32.mrb[24].mxu1  ;;  %1320 = sbr.rel (%p1657_p12) target bundleno = 1494 (0x5d6), region = 68  ;;  %1368 = vst [vmem:[%s2677_s13 + $0x18] sm:$0xff] (!%p1657_p12), %v1352_v35  ;;  %1371 = vst [vmem:[%s2677_s13 + $0x30] sm:$0xff] (!%p1657_p12), %v1355_v38 }
 0x5c6   : > { %v1297_v1 = vadd.f32 %v1276_v63, %v1144_v61  ;;  %v1278_v2 = vpop.f32.mrb[25].mxu1  ;;  %1372 = vst [vmem:[%s2677_s13 + $0x38] sm:$0xff] (!%p1657_p12), %v1356_v39 }
 0x5c7   : > { %v1298_v4 = vadd.f32 %v1278_v2, %v1145_v62  ;;  %v1280_v5 = vpop.f32.mrb[26].mxu1  ;;  %v1329_v26 = vld [vmem:[#allocation2 + $0x40] sm:$0xff] (!%p1657_p12) }
 0x5c8   : > { %1313 = vst [vmem:[#allocation2 + $0x60] sm:$0xff] %v1297_v1  ;;  %v1299_v6 = vadd.f32 %v1280_v5, %v1146_v0  ;;  %v1282_v7 = vpop.f32.mrb[27].mxu1  ;;  %v1330_v27 = vld [vmem:[#allocation2 + $0x48] sm:$0xff] (!%p1657_p12)  ;;  %v1357_v40 = vadd.f32 (!%p1657_p12), %v1342_v21, %v1329_v26 }
 0x5c9   : > { %1314 = vst [vmem:[#allocation2 + $0x68] sm:$0xff] %v1298_v4  ;;  %v1300_v8 = vadd.f32 %v1282_v7, %v1147_v3  ;;  %v1331_v29 = vld [vmem:[#allocation2 + $0x50] sm:$0xff] (!%p1657_p12)  ;;  %v1358_v41 = vadd.f32 (!%p1657_p12), %v1346_v22, %v1330_v27 }
 0x5ca   : > { %1315 = vst [vmem:[#allocation2 + $0x70] sm:$0xff] %v1299_v6  ;;  %v1332_v30 = vld [vmem:[#allocation2 + $0x58] sm:$0xff] (!%p1657_p12)  ;;  %v1359_v42 = vadd.f32 (!%p1657_p12), %v1342_v21, %v1331_v29  ;;  %1373 = vst [vmem:[%s2677_s13 + $0x40] sm:$0xff] (!%p1657_p12), %v1357_v40 }
 0x5cb   : > { %1316 = vst [vmem:[#allocation2 + $0x78] sm:$0xff] %v1300_v8  ;;  %v1360_v44 = vadd.f32 (!%p1657_p12), %v1346_v22, %v1332_v30  ;;  %1374 = vst [vmem:[%s2677_s13 + $0x48] sm:$0xff] (!%p1657_p12), %v1358_v41 }
 0x5cc   : > { %1375 = vst [vmem:[%s2677_s13 + $0x50] sm:$0xff] %v1359_v42 }
 0x5cd   : > { %1376 = vst [vmem:[%s2677_s13 + $0x58] sm:$0xff] %v1360_v44 }
 0x5cf   : > { %v1333_v31 = vld [vmem:[#allocation2 + $0x60] sm:$0xff] }
 0x5d0   : > { %v1334_v36 = vld [vmem:[#allocation2 + $0x68] sm:$0xff]  ;;  %v1361_v45 = vadd.f32 %v1342_v21, %v1333_v31 }
 0x5d1   : > { %v1335_v23 = vld [vmem:[#allocation2 + $0x70] sm:$0xff]  ;;  %v1362_v46 = vadd.f32 %v1346_v22, %v1334_v36 }
 0x5d2   : > { %v1336_v24 = vld [vmem:[#allocation2 + $0x78] sm:$0xff]  ;;  %v1363_v43 = vadd.f32 %v1342_v21, %v1335_v23  ;;  %1377 = vst [vmem:[%s2677_s13 + $0x60] sm:$0xff] %v1361_v45 }
 0x5d3   : > { %v1364_v47 = vadd.f32 %v1346_v22, %v1336_v24  ;;  %1378 = vst [vmem:[%s2677_s13 + $0x68] sm:$0xff] %v1362_v46 }
 0x5d4   : > { %1379 = vst [vmem:[%s2677_s13 + $0x70] sm:$0xff] %v1363_v43 }
 0x5d5   : > { %1380 = vst [vmem:[%s2677_s13 + $0x78] sm:$0xff] %v1364_v47 }
 0x5d6 PF: > { %s1666_s24 = sshll.u32 %s2277_s25, 11  ;;  %s2967_s6 = sld [smem:[#allocation33_spill]] }
 0x5d7   : > { %s1395_s23 = sshll.u32 %s2677_s13, 4  ;;  %s1382_s1 = scalar_lea.sflag [#allocation5], %s2646_s9  ;;  %s2840_s23 = int_to_ptr.vmem [resolvable:$true] %s1395_s23 }
 0x5d8   : > { %s2155_s15 = scalar_lea.vmem %s2840_s23, 2048  ;;  %p2968_p6 = scmp.ne.s32.totalorder %s2945_s18, 0 }
 0x5d9   : > { %p2156_p10 = scmp.ne.s32.totalorder %s2840_s23, %s2155_s15  ;;  %s2308_s14 = smov [#allocation12]  }
 0x5da   : > { %s2159_s16 = sshll.u32 %s2308_s14, 4  ;;  %s2160_s16 = int_to_ptr.vmem [resolvable:$false] %s2159_s16 }
 0x5db   : > { %p2157_p2 = pnand %p2156_p10, %p2968_p6  ;;  %s2161_s25 = scalar_lea.vmem %s2160_s16, 4096 }
 0x5dc   : > { %s2837_s21 = scalar_lea.hbm %s2967_s6, %s1666_s24  ;;  %p2162_p7 = scmp.lt.s32.totalorder %s2840_s23, %s2160_s16 }
 0x5dd   : > { %p2158_p4 = pneg %p2157_p2  ;;  %p2163_p11 = scmp.lt.s32.totalorder %s2161_s25, %s2155_s15 }
 0x5df   : > { %p2164_p5 = por %p2163_p11, %p2162_p7 }
 0x5e1   : > { %p2165_p0 = pnand %p2164_p5, %p2158_p4 }
 0x5e3   : > { %2168 = shalt.err (!%p2165_p0)
}
 0x5e4   : > { %s2169_s2 = scalar_lea.hbm %s2837_s21, 2048  ;;  %s2173_s7 = scalar_lea.hbm %s2967_s6, 4096 }
 0x5e5   : > { %p2170_p8 = scmp.ne.s32.totalorder %s2837_s21, %s2169_s2  ;;  %p2174_p1 = scmp.lt.u32.totalorder %s2837_s21, %s2967_s6 }
 0x5e6   : > { %p2175_p3 = scmp.lt.u32.totalorder %s2173_s7, %s2169_s2  ;;  %p2177_p10 = scmp.lt.u32.totalorder %s2169_s2, %s2837_s21 }
 0x5e7   : > { %p2171_p13 = pnand %p2170_p8, %p2968_p6 }
 0x5e8   : > { %p2176_p12 = por %p2175_p3, %p2174_p1 }
 0x5e9   : > { %p2172_p9 = pneg %p2171_p13 }
 0x5ea   : > { %p2178_p2 = por %p2177_p10, %p2176_p12 }
 0x5ec   : > { %p2179_p4 = pnand %p2178_p2, %p2172_p9 }
 0x5ee   : > { %2182 = shalt.err (!%p2179_p4)
}
 0x5ef   : > { %s2309_s0 = smov 256   ;;  %s2310_s30 = smov 16  }
 0x5f0   : > { %1858 = dma.vmem_to_hbm [thread:$0]  (%p2968_p6), %s2840_s23, 2048, %s2837_s21, %s1382_s1, %s2309_s0, %s2309_s0, %s2310_s30  }
 0x5f1 PF: > { %s2969_s12 = sld [smem:[#allocation21_spill]]  ;;  %s2970_s27 = sld [smem:[#allocation28_spill]] }
 0x5f2   : > { %p1870_p7 = scmp.ge.s32.totalorder %s2289_s28, 2 }
 0x5f7   : > { %s1410_s11 = sand.u32 1, %s2969_s12   ;;  %p2971_p11 = scmp.ne.s32.totalorder %s2970_s27, 0 }
 0x5f8   : > { %s1411_s13 = scalar_lea.sflag [#allocation5], %s1410_s11 }
 0x5f9   : > { %p1865_p5 = pnand %p1870_p7, %p2971_p11 }
 0x5fb   : > { %2244 = dma.done.wait (!%p1865_p5), %s1411_s13, 2048  }
 0x5fc   : > { %2246 = vsyncadd (!%p1865_p5), %s1411_s13, 4294965248  ;;  %s27_s28 = sadd.s32 1, %s2289_s28   ;;  %s2972_s24 = sld [smem:[#allocation26_spill]] }
 0x5fd   : > { %p24_p0 = scmp.ge.s32.totalorder %s27_s28, 10   ;;  %s2973_s9 = sld [smem:[#allocation22_spill]] }
 0x5fe   : > { %s2974_s23 = sld [smem:[#allocation27_spill]]  ;;  %s2975_s25 = sld [smem:[#allocation23_spill]] }
 0x5ff   : > { %s2976_s29 = sld [smem:[#allocation24_spill]]  ;;  %s2977_s27 = sld [smem:[#allocation25_spill]] }
 0x600   : > { %s2978_s18 = smov %s2253_s19  ;;  %s2979_s19 = smov %s2257_s20 }
 0x601   : > { %s2981_s21 = smov %s2265_s22  ;;  %26 = sbr.rel (!%p24_p0) target bundleno = 19 (0x13), region = 143 }
 0x602   : > { %s2980_s20 = smov %s2972_s24  ;;  %s2983_s24 = smov %s2281_s26 }
 0x603   : > { %s2982_s22 = smov %s2973_s9 }
 0x605   : > { %s2984_s26 = smov %s2976_s29 }
 0x608   :  { %1416 = vsyncpa [#allocation4], 1 }
 0x609   :  { %1418 = vsyncpa [#allocation4 + $0x1], 1 }
 0x60a   :  { %1419 = vsyncpa [#allocation7], 1 }
 0x60b   :  { %1421 = vsyncpa [#allocation7 + $0x1], 1 }
 0x60c   :  { %1422 = vsyncpa [#allocation10], 1 }
 0x60d   :  { %1424 = vsyncpa [#allocation10 + $0x1], 1 }
 0x60e   :  { %1425 = vsyncpa [#allocation5], 1 }
 0x60f   :  { %1427 = vsyncpa [#allocation5 + $0x1], 1 }

</bundles_post_ra>
